<compile_context>
chip_gen: v6e
topology: v6e:2x2x1
jax: 0.10.0
libtpu: 0.0.40
codegen_flags: <defaults>
</compile_context>

<pallas_src>
import functools

import jax
import jax.numpy as jnp
from jax.experimental import pallas as pl
from jax.experimental.pallas import tpu as pltpu


# ------------------------------ fused kernel --------------------------------

def _se_block_kernel(x_ref, s1_ref, b1_ref, B1_ref, s2_ref, b2_ref, B2_ref,
                     ss_ref, bs_ref, Bs_ref, pool_ref, w1t_ref, sb1_ref,
                     w2_ref, sb2_ref, scat_ref, o_ref,
                     pad1_ref, pat1_ref, pad2_ref, pat2_ref,
                     *, H, W, Cin, Cout, dil):
    WCin = W * Cin
    WCout = W * Cout
    taps = [(ky, kx) for ky in range(3) for kx in range(3)]

    x = x_ref[0]                                                  # (H, W*Cin)

    # ---- main path: BN1 + ReLU (lane-dense VPU; params pre-tiled per lane) --
    h = jnp.maximum(x * s1_ref[...] + b1_ref[...], 0.0)

    # ---- conv1: 3x3, pad=1 -- in-kernel halo pad + im2col + ONE MXU matmul --
    pad1_ref[...] = jnp.zeros_like(pad1_ref)
    pad1_ref[1:1 + H, Cin:Cin + WCin] = h
    xp = pad1_ref[...]
    for t, (ky, kx) in enumerate(taps):
        pat1_ref[:, t * WCin:(t + 1) * WCin] = (
            xp[ky:ky + H, kx * Cin:kx * Cin + WCin])
    h = jnp.dot(pat1_ref[...], B1_ref[...],
                preferred_element_type=jnp.float32)               # (H, W*Cout)

    # ---- BN2 + ReLU ----
    h = jnp.maximum(h * s2_ref[...] + b2_ref[...], 0.0)

    # ---- conv2: 3x3, dilation=dil, pad=dil ----
    pad2_ref[...] = jnp.zeros_like(pad2_ref)
    pad2_ref[dil:dil + H, dil * Cout:dil * Cout + WCout] = h
    xp = pad2_ref[...]
    for t, (ky, kx) in enumerate(taps):
        pat2_ref[:, t * WCout:(t + 1) * WCout] = (
            xp[ky * dil:ky * dil + H,
               kx * dil * Cout:kx * dil * Cout + WCout])
    h = jnp.dot(pat2_ref[...], B2_ref[...],
                preferred_element_type=jnp.float32)               # (H, W*Cout)

    # ---- shortcut: BN + ReLU + 1x1 conv (block-diagonal weights, one dot) --
    sc = jnp.maximum(x * ss_ref[...] + bs_ref[...], 0.0)
    sc = jnp.dot(sc, Bs_ref[...], preferred_element_type=jnp.float32)

    # ---- SE: avg-pool + two tiny matvecs + sigmoid, all on VPU/XLU/EUP ----
    colsum = jnp.sum(h, axis=0, keepdims=True)                    # (1, W*Cout)
    y = jnp.sum(pool_ref[...] * colsum, axis=1, keepdims=True)    # (Cout, 1)
    t1 = jnp.sum(w1t_ref[...] * y, axis=0, keepdims=True) + sb1_ref[...]
    t1 = jnp.maximum(t1, 0.0)                                     # (1, Cr)
    g = jnp.sum(w2_ref[...] * t1, axis=1, keepdims=True) + sb2_ref[...]
    z = jnp.exp(-jnp.abs(g))                                      # stable sigmoid
    g = jnp.where(g >= 0.0, 1.0 / (1.0 + z), z / (1.0 + z))       # (Cout, 1)
    g_row = jnp.sum(scat_ref[...] * g, axis=0, keepdims=True)     # (1, W*Cout)

    # ---- channel gate + residual add, full-lane store ----
    o_ref[0] = h * g_row + sc


# --------------------------------- wrapper ----------------------------------

def conv_block_forward(x_nchw, params, dilation_rate=1):
    N, Cin, H, W = x_nchw.shape
    Cout = params["se_b2"].shape[0]
    Cr = params["se_b1"].shape[1]
    WCin, WCout = W * Cin, W * Cout
    d = int(dilation_rate)

    # NCHW -> lane-packed (N, H, W*Cin); tiny boundary op (reshape is free).
    x = jnp.transpose(x_nchw, (0, 2, 3, 1)).reshape(N, H, WCin).astype(jnp.float32)

    kern = functools.partial(_se_block_kernel, H=H, W=W, Cin=Cin, Cout=Cout, dil=d)

    def rep(shape):
        return pl.BlockSpec(shape, lambda n: (0,) * len(shape))

    out = pl.pallas_call(
        kern,
        out_shape=jax.ShapeDtypeStruct((N, H, WCout), jnp.float32),
        grid=(N,),
        in_specs=[
            pl.BlockSpec((1, H, WCin), lambda n: (n, 0, 0)),   # x
            rep((1, WCin)), rep((1, WCin)),                    # bn1 scale/bias
            rep((9 * WCin, WCout)),                            # conv1 block-diag
            rep((1, WCout)), rep((1, WCout)),                  # bn2 scale/bias
            rep((9 * WCout, WCout)),                           # conv2 block-diag
            rep((1, WCin)), rep((1, WCin)),                    # shortcut bn
            rep((WCin, WCout)),                                # shortcut 1x1
            rep((Cout, WCout)),                                # SE pool matrix
            rep((Cout, Cr)), rep((1, Cr)),                     # SE w1^T, b1
            rep((Cout, Cr)), rep((Cout, 1)),                   # SE w2,  b2
            rep((Cout, WCout)),                                # SE scatter
        ],
        out_specs=pl.BlockSpec((1, H, WCout), lambda n: (n, 0, 0)),
        scratch_shapes=[
            pltpu.VMEM((H + 2, (W + 2) * Cin), jnp.float32),       # pad for conv1
            pltpu.VMEM((H, 9 * WCin), jnp.float32),                # patches conv1
            pltpu.VMEM((H + 2 * d, (W + 2 * d) * Cout), jnp.float32),  # pad conv2
            pltpu.VMEM((H, 9 * WCout), jnp.float32),               # patches conv2
        ],
        compiler_params=pltpu.CompilerParams(dimension_semantics=("parallel",)),
    )(x, params["bn1_s"], params["bn1_b"], params["conv1_B"],
      params["bn2_s"], params["bn2_b"], params["conv2_B"],
      params["bns_s"], params["bns_b"], params["convs_B"],
      params["se_pool"], params["se_w1t"], params["se_b1"],
      params["se_w2"], params["se_b2"], params["se_scat"])

    # lane-packed (N, H, W*Cout) -> NCHW
    return jnp.transpose(out.reshape(N, H, W, Cout), (0, 3, 1, 2))


# --------------------------- parameters (host side) -------------------------

def init_raw_params(key, in_ch, out_ch, reduction=2, eps=1e-5):
    """PyTorch-layout weights + folded inference-mode BN scale/bias."""
    cr = out_ch // reduction
    ks = jax.random.split(key, 10)
    f32 = jnp.float32

    def fold_bn(k, c):
        k1, k2, k3, k4 = jax.random.split(k, 4)
        gamma = jax.random.uniform(k1, (c,), f32, 0.5, 1.5)
        beta = 0.1 * jax.random.normal(k2, (c,), f32)
        mean = 0.1 * jax.random.normal(k3, (c,), f32)
        var = jax.random.uniform(k4, (c,), f32, 0.5, 1.5)
        scale = gamma / jnp.sqrt(var + eps)
        return scale, beta - mean * scale

    raw = {}
    raw["bn1_s"], raw["bn1_b"] = fold_bn(ks[0], in_ch)
    raw["conv1_w"] = 0.1 * jax.random.normal(ks[1], (out_ch, in_ch, 3, 3), f32)
    raw["bn2_s"], raw["bn2_b"] = fold_bn(ks[2], out_ch)
    raw["conv2_w"] = 0.1 * jax.random.normal(ks[3], (out_ch, out_ch, 3, 3), f32)
    raw["bns_s"], raw["bns_b"] = fold_bn(ks[4], in_ch)
    raw["convs_w"] = 0.1 * jax.random.normal(ks[5], (out_ch, in_ch), f32)
    raw["se_w1"] = 0.2 * jax.random.normal(ks[6], (cr, out_ch), f32)   # Conv2d(C, C//r, 1)
    raw["se_b1"] = 0.1 * jax.random.normal(ks[7], (cr,), f32)
    raw["se_w2"] = 0.2 * jax.random.normal(ks[8], (out_ch, cr), f32)   # Conv2d(C//r, C, 1)
    raw["se_b2"] = 0.1 * jax.random.normal(ks[9], (out_ch,), f32)
    return raw


def pack_params(raw, H, W):
    """Preprocess torch-layout weights into the kernel's lane-packed operands."""
    f32 = jnp.float32
    out_ch = raw["conv1_w"].shape[0]
    cr = raw["se_w1"].shape[0]
    eye_w = jnp.eye(W, dtype=f32)

    def tile_row(v):                       # (c,) -> (1, W*c): row[x*c+ci]=v[ci]
        return jnp.tile(v, W).reshape(1, W * v.shape[0])

    def blockdiag_3x3(w):                  # (Cout,Cin,3,3) -> (9*W*Cin, W*Cout)
        cout, cin = w.shape[0], w.shape[1]
        taps = jnp.transpose(w, (2, 3, 1, 0)).reshape(9, cin, cout)  # [t, ci, co]
        B = jnp.einsum("tio,xy->txiyo", taps, eye_w)
        return B.reshape(9 * W * cin, W * cout)

    def blockdiag_1x1(w):                  # (Cout,Cin) -> (W*Cin, W*Cout)
        cout, cin = w.shape
        B = jnp.einsum("oi,xy->xiyo", w, eye_w)
        return B.reshape(W * cin, W * cout)

    return {
        "bn1_s": tile_row(raw["bn1_s"]), "bn1_b": tile_row(raw["bn1_b"]),
        "conv1_B": blockdiag_3x3(raw["conv1_w"]),
        "bn2_s": tile_row(raw["bn2_s"]), "bn2_b": tile_row(raw["bn2_b"]),
        "conv2_B": blockdiag_3x3(raw["conv2_w"]),
        "bns_s": tile_row(raw["bns_s"]), "bns_b": tile_row(raw["bns_b"]),
        "convs_B": blockdiag_1x1(raw["convs_w"]),
        "se_w1t": jnp.transpose(raw["se_w1"]),          # (C, Cr)
        "se_b1": raw["se_b1"].reshape(1, cr),
        "se_w2": raw["se_w2"],                          # (C, Cr)
        "se_b2": raw["se_b2"].reshape(out_ch, 1),
        "se_pool": jnp.tile(jnp.eye(out_ch, dtype=f32), (1, W)) / float(H * W),
        "se_scat": jnp.tile(jnp.eye(out_ch, dtype=f32), (1, W)),
    }


# ------------------------- pure-XLA reference (check) ------------------------

def reference_forward(x, raw, dilation_rate=1):
    def bn_relu(v, s, b):
        return jnp.maximum(v * s[None, :, None, None] + b[None, :, None, None], 0.0)

    def conv3x3(v, w, d):
        return jax.lax.conv_general_dilated(
            v, w, window_strides=(1, 1), padding=[(d, d), (d, d)],
            rhs_dilation=(d, d), dimension_numbers=("NCHW", "OIHW", "NCHW"))

    h = conv3x3(bn_relu(x, raw["bn1_s"], raw["bn1_b"]), raw["conv1_w"], 1)
    h = conv3x3(bn_relu(h, raw["bn2_s"], raw["bn2_b"]), raw["conv2_w"], dilation_rate)
    y = jnp.mean(h, axis=(2, 3), keepdims=True)
    y = jnp.einsum("rc,ncij->nrij", raw["se_w1"], y) + raw["se_b1"][None, :, None, None]
    y = jnp.maximum(y, 0.0)
    y = jnp.einsum("cr,nrij->ncij", raw["se_w2"], y) + raw["se_b2"][None, :, None, None]
    h = h * jax.nn.sigmoid(y)
    s = bn_relu(x, raw["bns_s"], raw["bns_b"])
    s = jnp.einsum("oi,nihw->nohw", raw["convs_w"], s)
    return h + s


if __name__ == "__main__":
    key = jax.random.PRNGKey(0)
    kx, kp = jax.random.split(key)

    N, in_ch, out_ch, H, W = 2, 4, 8, 16, 16
    x = jax.random.normal(kx, (N, in_ch, H, W), jnp.float32)

    raw = init_raw_params(kp, in_ch, out_ch, reduction=2)
    params = pack_params(raw, H, W)

    out = conv_block_forward(x, params, dilation_rate=1)
    out = jax.block_until_ready(out)

    assert out.shape == (N, out_ch, H, W), out.shape
    assert bool(jnp.all(jnp.isfinite(out)))

    # sanity check against a pure-XLA reference of the same forward pass
    ref = reference_forward(x, raw, dilation_rate=1)
    assert jnp.allclose(out, ref, rtol=1e-2, atol=1e-2), (
        "max abs err = %f" % float(jnp.max(jnp.abs(out - ref))))

    print("KERNEL_OK")
</pallas_src>

<mosaic_0001>
module attributes {stable_mosaic.version = 11 : i64} {
  func.func @_se_block_kernel(%arg0: i32, %arg1: memref<1x16x64xf32, #tpu.memory_space<vmem>>, %arg2: memref<1x64xf32, #tpu.memory_space<vmem>>, %arg3: memref<1x64xf32, #tpu.memory_space<vmem>>, %arg4: memref<576x128xf32, #tpu.memory_space<vmem>>, %arg5: memref<1x128xf32, #tpu.memory_space<vmem>>, %arg6: memref<1x128xf32, #tpu.memory_space<vmem>>, %arg7: memref<1152x128xf32, #tpu.memory_space<vmem>>, %arg8: memref<1x64xf32, #tpu.memory_space<vmem>>, %arg9: memref<1x64xf32, #tpu.memory_space<vmem>>, %arg10: memref<64x128xf32, #tpu.memory_space<vmem>>, %arg11: memref<8x128xf32, #tpu.memory_space<vmem>>, %arg12: memref<8x4xf32, #tpu.memory_space<vmem>>, %arg13: memref<1x4xf32, #tpu.memory_space<vmem>>, %arg14: memref<8x4xf32, #tpu.memory_space<vmem>>, %arg15: memref<8x1xf32, #tpu.memory_space<vmem>>, %arg16: memref<8x128xf32, #tpu.memory_space<vmem>>, %arg17: memref<1x16x128xf32, #tpu.memory_space<vmem>>, %arg18: memref<18x72xf32, #tpu.memory_space<vmem>>, %arg19: memref<16x576xf32, #tpu.memory_space<vmem>>, %arg20: memref<18x144xf32, #tpu.memory_space<vmem>>, %arg21: memref<16x1152xf32, #tpu.memory_space<vmem>>) attributes {dimension_semantics = [#tpu.dimension_semantics<parallel>], iteration_bounds = array<i64: 2>, scalar_prefetch = 0 : i64, scratch_operands = 4 : i64, tpu.core_type = #tpu.core_type<tc>, window_params = [{transform_indices = @transform_0, window_bounds = array<i64: 1, 16, 64>}, {pipeline_mode = #tpu.pipeline_mode<synchronous>, transform_indices = @transform_1, window_bounds = array<i64: 1, 64>}, {pipeline_mode = #tpu.pipeline_mode<synchronous>, transform_indices = @transform_2, window_bounds = array<i64: 1, 64>}, {pipeline_mode = #tpu.pipeline_mode<synchronous>, transform_indices = @transform_3, window_bounds = array<i64: 576, 128>}, {pipeline_mode = #tpu.pipeline_mode<synchronous>, transform_indices = @transform_4, window_bounds = array<i64: 1, 128>}, {pipeline_mode = #tpu.pipeline_mode<synchronous>, transform_indices = @transform_5, window_bounds = array<i64: 1, 128>}, {pipeline_mode = #tpu.pipeline_mode<synchronous>, transform_indices = @transform_6, window_bounds = array<i64: 1152, 128>}, {pipeline_mode = #tpu.pipeline_mode<synchronous>, transform_indices = @transform_7, window_bounds = array<i64: 1, 64>}, {pipeline_mode = #tpu.pipeline_mode<synchronous>, transform_indices = @transform_8, window_bounds = array<i64: 1, 64>}, {pipeline_mode = #tpu.pipeline_mode<synchronous>, transform_indices = @transform_9, window_bounds = array<i64: 64, 128>}, {pipeline_mode = #tpu.pipeline_mode<synchronous>, transform_indices = @transform_10, window_bounds = array<i64: 8, 128>}, {pipeline_mode = #tpu.pipeline_mode<synchronous>, transform_indices = @transform_11, window_bounds = array<i64: 8, 4>}, {pipeline_mode = #tpu.pipeline_mode<synchronous>, transform_indices = @transform_12, window_bounds = array<i64: 1, 4>}, {pipeline_mode = #tpu.pipeline_mode<synchronous>, transform_indices = @transform_13, window_bounds = array<i64: 8, 4>}, {pipeline_mode = #tpu.pipeline_mode<synchronous>, transform_indices = @transform_14, window_bounds = array<i64: 8, 1>}, {pipeline_mode = #tpu.pipeline_mode<synchronous>, transform_indices = @transform_15, window_bounds = array<i64: 8, 128>}, {transform_indices = @transform_16, window_bounds = array<i64: 1, 16, 128>}]} {
    %c0 = arith.constant 0 : index
    %c0_0 = arith.constant 0 : index
    %c0_1 = arith.constant 0 : index
    %0 = vector.load %arg1[%c0, %c0_0, %c0_1] : memref<1x16x64xf32, #tpu.memory_space<vmem>>, vector<1x16x64xf32>
    %1 = vector.shape_cast %0 : vector<1x16x64xf32> to vector<16x64xf32>
    %c0_2 = arith.constant 0 : index
    %c0_3 = arith.constant 0 : index
    %2 = vector.load %arg2[%c0_2, %c0_3] : memref<1x64xf32, #tpu.memory_space<vmem>>, vector<1x64xf32>
    %3 = vector.broadcast %2 : vector<1x64xf32> to vector<16x64xf32>
    %4 = arith.mulf %1, %3 : vector<16x64xf32>
    %c0_4 = arith.constant 0 : index
    %c0_5 = arith.constant 0 : index
    %5 = vector.load %arg3[%c0_4, %c0_5] : memref<1x64xf32, #tpu.memory_space<vmem>>, vector<1x64xf32>
    %6 = vector.broadcast %5 : vector<1x64xf32> to vector<16x64xf32>
    %7 = arith.addf %4, %6 : vector<16x64xf32>
    %cst = arith.constant 0.000000e+00 : f32
    %8 = vector.broadcast %cst : f32 to vector<16x64xf32>
    %9 = arith.maximumf %7, %8 : vector<16x64xf32>
    %cst_6 = arith.constant 0.000000e+00 : f32
    %10 = vector.broadcast %cst_6 : f32 to vector<18x72xf32>
    %c0_7 = arith.constant 0 : index
    %c0_8 = arith.constant 0 : index
    %11 = vector.load %arg18[%c0_7, %c0_8] : memref<18x72xf32, #tpu.memory_space<vmem>>, vector<18x72xf32>
    tpu.vector_store %arg18[%c0_7, %c0_8], %10 {strides = array<i32>} : memref<18x72xf32, #tpu.memory_space<vmem>>, vector<18x72xf32>,
    %c1 = arith.constant 1 : index
    %c4 = arith.constant 4 : index
    %12 = vector.load %arg18[%c1, %c4] : memref<18x72xf32, #tpu.memory_space<vmem>>, vector<16x64xf32>
    tpu.vector_store %arg18[%c1, %c4], %9 {strides = array<i32>} : memref<18x72xf32, #tpu.memory_space<vmem>>, vector<16x64xf32>,
    %c0_9 = arith.constant 0 : index
    %c0_10 = arith.constant 0 : index
    %13 = vector.load %arg18[%c0_9, %c0_10] : memref<18x72xf32, #tpu.memory_space<vmem>>, vector<18x72xf32>
    %14 = vector.extract_strided_slice %13 {offsets = [0, 0], sizes = [16, 64], strides = [1, 1]} : vector<18x72xf32> to vector<16x64xf32>
    %c0_11 = arith.constant 0 : index
    %c0_12 = arith.constant 0 : index
    %15 = vector.load %arg19[%c0_11, %c0_12] : memref<16x576xf32, #tpu.memory_space<vmem>>, vector<16x64xf32>
    tpu.vector_store %arg19[%c0_11, %c0_12], %14 {strides = array<i32>} : memref<16x576xf32, #tpu.memory_space<vmem>>, vector<16x64xf32>,
    %16 = vector.extract_strided_slice %13 {offsets = [0, 4], sizes = [16, 64], strides = [1, 1]} : vector<18x72xf32> to vector<16x64xf32>
    %c0_13 = arith.constant 0 : index
    %c64 = arith.constant 64 : index
    %17 = vector.load %arg19[%c0_13, %c64] : memref<16x576xf32, #tpu.memory_space<vmem>>, vector<16x64xf32>
    tpu.vector_store %arg19[%c0_13, %c64], %16 {strides = array<i32>} : memref<16x576xf32, #tpu.memory_space<vmem>>, vector<16x64xf32>,
    %18 = vector.extract_strided_slice %13 {offsets = [0, 8], sizes = [16, 64], strides = [1, 1]} : vector<18x72xf32> to vector<16x64xf32>
    %c0_14 = arith.constant 0 : index
    %c128 = arith.constant 128 : index
    %19 = vector.load %arg19[%c0_14, %c128] : memref<16x576xf32, #tpu.memory_space<vmem>>, vector<16x64xf32>
    tpu.vector_store %arg19[%c0_14, %c128], %18 {strides = array<i32>} : memref<16x576xf32, #tpu.memory_space<vmem>>, vector<16x64xf32>,
    %20 = vector.extract_strided_slice %13 {offsets = [1, 0], sizes = [16, 64], strides = [1, 1]} : vector<18x72xf32> to vector<16x64xf32>
    %c0_15 = arith.constant 0 : index
    %c192 = arith.constant 192 : index
    %21 = vector.load %arg19[%c0_15, %c192] : memref<16x576xf32, #tpu.memory_space<vmem>>, vector<16x64xf32>
    tpu.vector_store %arg19[%c0_15, %c192], %20 {strides = array<i32>} : memref<16x576xf32, #tpu.memory_space<vmem>>, vector<16x64xf32>,
    %22 = vector.extract_strided_slice %13 {offsets = [1, 4], sizes = [16, 64], strides = [1, 1]} : vector<18x72xf32> to vector<16x64xf32>
    %c0_16 = arith.constant 0 : index
    %c256 = arith.constant 256 : index
    %23 = vector.load %arg19[%c0_16, %c256] : memref<16x576xf32, #tpu.memory_space<vmem>>, vector<16x64xf32>
    tpu.vector_store %arg19[%c0_16, %c256], %22 {strides = array<i32>} : memref<16x576xf32, #tpu.memory_space<vmem>>, vector<16x64xf32>,
    %24 = vector.extract_strided_slice %13 {offsets = [1, 8], sizes = [16, 64], strides = [1, 1]} : vector<18x72xf32> to vector<16x64xf32>
    %c0_17 = arith.constant 0 : index
    %c320 = arith.constant 320 : index
    %25 = vector.load %arg19[%c0_17, %c320] : memref<16x576xf32, #tpu.memory_space<vmem>>, vector<16x64xf32>
    tpu.vector_store %arg19[%c0_17, %c320], %24 {strides = array<i32>} : memref<16x576xf32, #tpu.memory_space<vmem>>, vector<16x64xf32>,
    %26 = vector.extract_strided_slice %13 {offsets = [2, 0], sizes = [16, 64], strides = [1, 1]} : vector<18x72xf32> to vector<16x64xf32>
    %c0_18 = arith.constant 0 : index
    %c384 = arith.constant 384 : index
    %27 = vector.load %arg19[%c0_18, %c384] : memref<16x576xf32, #tpu.memory_space<vmem>>, vector<16x64xf32>
    tpu.vector_store %arg19[%c0_18, %c384], %26 {strides = array<i32>} : memref<16x576xf32, #tpu.memory_space<vmem>>, vector<16x64xf32>,
    %28 = vector.extract_strided_slice %13 {offsets = [2, 4], sizes = [16, 64], strides = [1, 1]} : vector<18x72xf32> to vector<16x64xf32>
    %c0_19 = arith.constant 0 : index
    %c448 = arith.constant 448 : index
    %29 = vector.load %arg19[%c0_19, %c448] : memref<16x576xf32, #tpu.memory_space<vmem>>, vector<16x64xf32>
    tpu.vector_store %arg19[%c0_19, %c448], %28 {strides = array<i32>} : memref<16x576xf32, #tpu.memory_space<vmem>>, vector<16x64xf32>,
    %30 = vector.extract_strided_slice %13 {offsets = [2, 8], sizes = [16, 64], strides = [1, 1]} : vector<18x72xf32> to vector<16x64xf32>
    %c0_20 = arith.constant 0 : index
    %c512 = arith.constant 512 : index
    %31 = vector.load %arg19[%c0_20, %c512] : memref<16x576xf32, #tpu.memory_space<vmem>>, vector<16x64xf32>
    tpu.vector_store %arg19[%c0_20, %c512], %30 {strides = array<i32>} : memref<16x576xf32, #tpu.memory_space<vmem>>, vector<16x64xf32>,
    %c0_21 = arith.constant 0 : index
    %c0_22 = arith.constant 0 : index
    %32 = vector.load %arg19[%c0_21, %c0_22] : memref<16x576xf32, #tpu.memory_space<vmem>>, vector<16x576xf32>
    %c0_23 = arith.constant 0 : index
    %c0_24 = arith.constant 0 : index
    %33 = vector.load %arg4[%c0_23, %c0_24] : memref<576x128xf32, #tpu.memory_space<vmem>>, vector<576x128xf32>
    %cst_25 = arith.constant dense<0.000000e+00> : vector<16x128xf32>
    %34 = tpu.matmul %32, %33, %cst_25 {dimension_numbers = #tpu.dot_dimension_numbers<[1], [0], [0], [1], [0, 0, 1, 1], [], []>} : vector<16x576xf32>, vector<576x128xf32>, vector<16x128xf32> -> vector<16x128xf32>
    %c0_26 = arith.constant 0 : index
    %c0_27 = arith.constant 0 : index
    %35 = vector.load %arg5[%c0_26, %c0_27] : memref<1x128xf32, #tpu.memory_space<vmem>>, vector<1x128xf32>
    %36 = vector.broadcast %35 : vector<1x128xf32> to vector<16x128xf32>
    %37 = arith.mulf %34, %36 : vector<16x128xf32>
    %c0_28 = arith.constant 0 : index
    %c0_29 = arith.constant 0 : index
    %38 = vector.load %arg6[%c0_28, %c0_29] : memref<1x128xf32, #tpu.memory_space<vmem>>, vector<1x128xf32>
    %39 = vector.broadcast %38 : vector<1x128xf32> to vector<16x128xf32>
    %40 = arith.addf %37, %39 : vector<16x128xf32>
    %cst_30 = arith.constant 0.000000e+00 : f32
    %41 = vector.broadcast %cst_30 : f32 to vector<16x128xf32>
    %42 = arith.maximumf %40, %41 : vector<16x128xf32>
    %cst_31 = arith.constant 0.000000e+00 : f32
    %43 = vector.broadcast %cst_31 : f32 to vector<18x144xf32>
    %c0_32 = arith.constant 0 : index
    %c0_33 = arith.constant 0 : index
    %44 = vector.load %arg20[%c0_32, %c0_33] : memref<18x144xf32, #tpu.memory_space<vmem>>, vector<18x144xf32>
    tpu.vector_store %arg20[%c0_32, %c0_33], %43 {strides = array<i32>} : memref<18x144xf32, #tpu.memory_space<vmem>>, vector<18x144xf32>,
    %c1_34 = arith.constant 1 : index
    %c8 = arith.constant 8 : index
    %45 = vector.load %arg20[%c1_34, %c8] : memref<18x144xf32, #tpu.memory_space<vmem>>, vector<16x128xf32>
    tpu.vector_store %arg20[%c1_34, %c8], %42 {strides = array<i32>} : memref<18x144xf32, #tpu.memory_space<vmem>>, vector<16x128xf32>,
    %c0_35 = arith.constant 0 : index
    %c0_36 = arith.constant 0 : index
    %46 = vector.load %arg20[%c0_35, %c0_36] : memref<18x144xf32, #tpu.memory_space<vmem>>, vector<18x144xf32>
    %47 = vector.extract_strided_slice %46 {offsets = [0, 0], sizes = [16, 128], strides = [1, 1]} : vector<18x144xf32> to vector<16x128xf32>
    %c0_37 = arith.constant 0 : index
    %c0_38 = arith.constant 0 : index
    %48 = vector.load %arg21[%c0_37, %c0_38] : memref<16x1152xf32, #tpu.memory_space<vmem>>, vector<16x128xf32>
    tpu.vector_store %arg21[%c0_37, %c0_38], %47 {strides = array<i32>} : memref<16x1152xf32, #tpu.memory_space<vmem>>, vector<16x128xf32>,
    %49 = vector.extract_strided_slice %46 {offsets = [0, 8], sizes = [16, 128], strides = [1, 1]} : vector<18x144xf32> to vector<16x128xf32>
    %c0_39 = arith.constant 0 : index
    %c128_40 = arith.constant 128 : index
    %50 = vector.load %arg21[%c0_39, %c128_40] : memref<16x1152xf32, #tpu.memory_space<vmem>>, vector<16x128xf32>
    tpu.vector_store %arg21[%c0_39, %c128_40], %49 {strides = array<i32>} : memref<16x1152xf32, #tpu.memory_space<vmem>>, vector<16x128xf32>,
    %51 = vector.extract_strided_slice %46 {offsets = [0, 16], sizes = [16, 128], strides = [1, 1]} : vector<18x144xf32> to vector<16x128xf32>
    %c0_41 = arith.constant 0 : index
    %c256_42 = arith.constant 256 : index
    %52 = vector.load %arg21[%c0_41, %c256_42] : memref<16x1152xf32, #tpu.memory_space<vmem>>, vector<16x128xf32>
    tpu.vector_store %arg21[%c0_41, %c256_42], %51 {strides = array<i32>} : memref<16x1152xf32, #tpu.memory_space<vmem>>, vector<16x128xf32>,
    %53 = vector.extract_strided_slice %46 {offsets = [1, 0], sizes = [16, 128], strides = [1, 1]} : vector<18x144xf32> to vector<16x128xf32>
    %c0_43 = arith.constant 0 : index
    %c384_44 = arith.constant 384 : index
    %54 = vector.load %arg21[%c0_43, %c384_44] : memref<16x1152xf32, #tpu.memory_space<vmem>>, vector<16x128xf32>
    tpu.vector_store %arg21[%c0_43, %c384_44], %53 {strides = array<i32>} : memref<16x1152xf32, #tpu.memory_space<vmem>>, vector<16x128xf32>,
    %55 = vector.extract_strided_slice %46 {offsets = [1, 8], sizes = [16, 128], strides = [1, 1]} : vector<18x144xf32> to vector<16x128xf32>
    %c0_45 = arith.constant 0 : index
    %c512_46 = arith.constant 512 : index
    %56 = vector.load %arg21[%c0_45, %c512_46] : memref<16x1152xf32, #tpu.memory_space<vmem>>, vector<16x128xf32>
    tpu.vector_store %arg21[%c0_45, %c512_46], %55 {strides = array<i32>} : memref<16x1152xf32, #tpu.memory_space<vmem>>, vector<16x128xf32>,
    %57 = vector.extract_strided_slice %46 {offsets = [1, 16], sizes = [16, 128], strides = [1, 1]} : vector<18x144xf32> to vector<16x128xf32>
    %c0_47 = arith.constant 0 : index
    %c640 = arith.constant 640 : index
    %58 = vector.load %arg21[%c0_47, %c640] : memref<16x1152xf32, #tpu.memory_space<vmem>>, vector<16x128xf32>
    tpu.vector_store %arg21[%c0_47, %c640], %57 {strides = array<i32>} : memref<16x1152xf32, #tpu.memory_space<vmem>>, vector<16x128xf32>,
    %59 = vector.extract_strided_slice %46 {offsets = [2, 0], sizes = [16, 128], strides = [1, 1]} : vector<18x144xf32> to vector<16x128xf32>
    %c0_48 = arith.constant 0 : index
    %c768 = arith.constant 768 : index
    %60 = vector.load %arg21[%c0_48, %c768] : memref<16x1152xf32, #tpu.memory_space<vmem>>, vector<16x128xf32>
    tpu.vector_store %arg21[%c0_48, %c768], %59 {strides = array<i32>} : memref<16x1152xf32, #tpu.memory_space<vmem>>, vector<16x128xf32>,
    %61 = vector.extract_strided_slice %46 {offsets = [2, 8], sizes = [16, 128], strides = [1, 1]} : vector<18x144xf32> to vector<16x128xf32>
    %c0_49 = arith.constant 0 : index
    %c896 = arith.constant 896 : index
    %62 = vector.load %arg21[%c0_49, %c896] : memref<16x1152xf32, #tpu.memory_space<vmem>>, vector<16x128xf32>
    tpu.vector_store %arg21[%c0_49, %c896], %61 {strides = array<i32>} : memref<16x1152xf32, #tpu.memory_space<vmem>>, vector<16x128xf32>,
    %63 = vector.extract_strided_slice %46 {offsets = [2, 16], sizes = [16, 128], strides = [1, 1]} : vector<18x144xf32> to vector<16x128xf32>
    %c0_50 = arith.constant 0 : index
    %c1024 = arith.constant 1024 : index
    %64 = vector.load %arg21[%c0_50, %c1024] : memref<16x1152xf32, #tpu.memory_space<vmem>>, vector<16x128xf32>
    tpu.vector_store %arg21[%c0_50, %c1024], %63 {strides = array<i32>} : memref<16x1152xf32, #tpu.memory_space<vmem>>, vector<16x128xf32>,
    %c0_51 = arith.constant 0 : index
    %c0_52 = arith.constant 0 : index
    %65 = vector.load %arg21[%c0_51, %c0_52] : memref<16x1152xf32, #tpu.memory_space<vmem>>, vector<16x1152xf32>
    %c0_53 = arith.constant 0 : index
    %c0_54 = arith.constant 0 : index
    %66 = vector.load %arg7[%c0_53, %c0_54] : memref<1152x128xf32, #tpu.memory_space<vmem>>, vector<1152x128xf32>
    %cst_55 = arith.constant dense<0.000000e+00> : vector<16x128xf32>
    %67 = tpu.matmul %65, %66, %cst_55 {dimension_numbers = #tpu.dot_dimension_numbers<[1], [0], [0], [1], [0, 0, 1, 1], [], []>} : vector<16x1152xf32>, vector<1152x128xf32>, vector<16x128xf32> -> vector<16x128xf32>
    %c0_56 = arith.constant 0 : index
    %c0_57 = arith.constant 0 : index
    %68 = vector.load %arg8[%c0_56, %c0_57] : memref<1x64xf32, #tpu.memory_space<vmem>>, vector<1x64xf32>
    %69 = vector.broadcast %68 : vector<1x64xf32> to vector<16x64xf32>
    %70 = arith.mulf %1, %69 : vector<16x64xf32>
    %c0_58 = arith.constant 0 : index
    %c0_59 = arith.constant 0 : index
    %71 = vector.load %arg9[%c0_58, %c0_59] : memref<1x64xf32, #tpu.memory_space<vmem>>, vector<1x64xf32>
    %72 = vector.broadcast %71 : vector<1x64xf32> to vector<16x64xf32>
    %73 = arith.addf %70, %72 : vector<16x64xf32>
    %cst_60 = arith.constant 0.000000e+00 : f32
    %74 = vector.broadcast %cst_60 : f32 to vector<16x64xf32>
    %75 = arith.maximumf %73, %74 : vector<16x64xf32>
    %c0_61 = arith.constant 0 : index
    %c0_62 = arith.constant 0 : index
    %76 = vector.load %arg10[%c0_61, %c0_62] : memref<64x128xf32, #tpu.memory_space<vmem>>, vector<64x128xf32>
    %cst_63 = arith.constant dense<0.000000e+00> : vector<16x128xf32>
    %77 = tpu.matmul %75, %76, %cst_63 {dimension_numbers = #tpu.dot_dimension_numbers<[1], [0], [0], [1], [0, 0, 1, 1], [], []>} : vector<16x64xf32>, vector<64x128xf32>, vector<16x128xf32> -> vector<16x128xf32>
    %cst_64 = arith.constant dense<0.000000e+00> : vector<128xf32>
    %78 = vector.multi_reduction <add>, %67, %cst_64 [0] : vector<16x128xf32> to vector<128xf32>
    %79 = vector.shape_cast %78 : vector<128xf32> to vector<1x128xf32>
    %c0_65 = arith.constant 0 : index
    %c0_66 = arith.constant 0 : index
    %80 = vector.load %arg11[%c0_65, %c0_66] : memref<8x128xf32, #tpu.memory_space<vmem>>, vector<8x128xf32>
    %81 = vector.broadcast %79 : vector<1x128xf32> to vector<8x128xf32>
    %82 = arith.mulf %80, %81 : vector<8x128xf32>
    %cst_67 = arith.constant dense<0.000000e+00> : vector<8xf32>
    %83 = vector.multi_reduction <add>, %82, %cst_67 [1] : vector<8x128xf32> to vector<8xf32>
    %84 = vector.shape_cast %83 : vector<8xf32> to vector<8x1xf32>
    %c0_68 = arith.constant 0 : index
    %c0_69 = arith.constant 0 : index
    %85 = vector.load %arg12[%c0_68, %c0_69] : memref<8x4xf32, #tpu.memory_space<vmem>>, vector<8x4xf32>
    %86 = vector.broadcast %84 : vector<8x1xf32> to vector<8x4xf32>
    %87 = arith.mulf %85, %86 : vector<8x4xf32>
    %cst_70 = arith.constant dense<0.000000e+00> : vector<4xf32>
    %88 = vector.multi_reduction <add>, %87, %cst_70 [0] : vector<8x4xf32> to vector<4xf32>
    %89 = vector.shape_cast %88 : vector<4xf32> to vector<1x4xf32>
    %c0_71 = arith.constant 0 : index
    %c0_72 = arith.constant 0 : index
    %90 = vector.load %arg13[%c0_71, %c0_72] : memref<1x4xf32, #tpu.memory_space<vmem>>, vector<1x4xf32>
    %91 = arith.addf %89, %90 : vector<1x4xf32>
    %cst_73 = arith.constant 0.000000e+00 : f32
    %92 = vector.broadcast %cst_73 : f32 to vector<1x4xf32>
    %93 = arith.maximumf %91, %92 : vector<1x4xf32>
    %c0_74 = arith.constant 0 : index
    %c0_75 = arith.constant 0 : index
    %94 = vector.load %arg14[%c0_74, %c0_75] : memref<8x4xf32, #tpu.memory_space<vmem>>, vector<8x4xf32>
    %95 = vector.broadcast %93 : vector<1x4xf32> to vector<8x4xf32>
    %96 = arith.mulf %94, %95 : vector<8x4xf32>
    %cst_76 = arith.constant dense<0.000000e+00> : vector<8xf32>
    %97 = vector.multi_reduction <add>, %96, %cst_76 [1] : vector<8x4xf32> to vector<8xf32>
    %98 = vector.shape_cast %97 : vector<8xf32> to vector<8x1xf32>
    %c0_77 = arith.constant 0 : index
    %c0_78 = arith.constant 0 : index
    %99 = vector.load %arg15[%c0_77, %c0_78] : memref<8x1xf32, #tpu.memory_space<vmem>>, vector<8x1xf32>
    %100 = arith.addf %98, %99 : vector<8x1xf32>
    %101 = math.absf %100 : vector<8x1xf32>
    %cst_79 = arith.constant 0.000000e+00 : f32
    %102 = vector.broadcast %cst_79 : f32 to vector<8x1xf32>
    %103 = arith.subf %102, %101 : vector<8x1xf32>
    %104 = math.exp %103 : vector<8x1xf32>
    %cst_80 = arith.constant 0.000000e+00 : f32
    %105 = vector.broadcast %cst_80 : f32 to vector<8x1xf32>
    %106 = arith.cmpf oge, %100, %105 : vector<8x1xf32>
    %cst_81 = arith.constant 1.000000e+00 : f32
    %107 = vector.broadcast %cst_81 : f32 to vector<8x1xf32>
    %108 = arith.addf %107, %104 : vector<8x1xf32>
    %cst_82 = arith.constant 1.000000e+00 : f32
    %109 = vector.broadcast %cst_82 : f32 to vector<8x1xf32>
    %110 = arith.divf %109, %108 : vector<8x1xf32>
    %cst_83 = arith.constant 1.000000e+00 : f32
    %111 = vector.broadcast %cst_83 : f32 to vector<8x1xf32>
    %112 = arith.addf %111, %104 : vector<8x1xf32>
    %113 = arith.divf %104, %112 : vector<8x1xf32>
    %114 = arith.select %106, %110, %113 : vector<8x1xi1>, vector<8x1xf32>
    %c0_84 = arith.constant 0 : index
    %c0_85 = arith.constant 0 : index
    %115 = vector.load %arg16[%c0_84, %c0_85] : memref<8x128xf32, #tpu.memory_space<vmem>>, vector<8x128xf32>
    %116 = vector.broadcast %114 : vector<8x1xf32> to vector<8x128xf32>
    %117 = arith.mulf %115, %116 : vector<8x128xf32>
    %cst_86 = arith.constant dense<0.000000e+00> : vector<128xf32>
    %118 = vector.multi_reduction <add>, %117, %cst_86 [0] : vector<8x128xf32> to vector<128xf32>
    %119 = vector.shape_cast %118 : vector<128xf32> to vector<1x128xf32>
    %120 = vector.broadcast %119 : vector<1x128xf32> to vector<16x128xf32>
    %121 = arith.mulf %67, %120 : vector<16x128xf32>
    %122 = arith.addf %121, %77 : vector<16x128xf32>
    %c0_87 = arith.constant 0 : index
    %c0_88 = arith.constant 0 : index
    %c0_89 = arith.constant 0 : index
    %123 = vector.load %arg17[%c0_87, %c0_88, %c0_89] : memref<1x16x128xf32, #tpu.memory_space<vmem>>, vector<1x16x128xf32>
    %124 = vector.shape_cast %123 : vector<1x16x128xf32> to vector<16x128xf32>
    %125 = vector.shape_cast %122 : vector<16x128xf32> to vector<1x16x128xf32>
    tpu.vector_store %arg17[%c0_87, %c0_88, %c0_89], %125 {strides = array<i32>} : memref<1x16x128xf32, #tpu.memory_space<vmem>>, vector<1x16x128xf32>,
    return
  }
  func.func @transform_0(%arg0: i32) -> (i32, i32, i32) {
    %c0_i32 = arith.constant 0 : i32
    %c0_i32_0 = arith.constant 0 : i32
    %c0_i32_1 = arith.constant 0 : i32
    return %arg0, %c0_i32, %c0_i32_0 : i32, i32, i32
  }
  func.func @transform_1(%arg0: i32) -> (i32, i32) {
    %c0_i32 = arith.constant 0 : i32
    %c0_i32_0 = arith.constant 0 : i32
    %c0_i32_1 = arith.constant 0 : i32
    return %c0_i32, %c0_i32_0 : i32, i32
  }
  func.func @transform_2(%arg0: i32) -> (i32, i32) {
    %c0_i32 = arith.constant 0 : i32
    %c0_i32_0 = arith.constant 0 : i32
    %c0_i32_1 = arith.constant 0 : i32
    return %c0_i32, %c0_i32_0 : i32, i32
  }
  func.func @transform_3(%arg0: i32) -> (i32, i32) {
    %c0_i32 = arith.constant 0 : i32
    %c0_i32_0 = arith.constant 0 : i32
    %c0_i32_1 = arith.constant 0 : i32
    return %c0_i32, %c0_i32_0 : i32, i32
  }
  func.func @transform_4(%arg0: i32) -> (i32, i32) {
    %c0_i32 = arith.constant 0 : i32
    %c0_i32_0 = arith.constant 0 : i32
    %c0_i32_1 = arith.constant 0 : i32
    return %c0_i32, %c0_i32_0 : i32, i32
  }
  func.func @transform_5(%arg0: i32) -> (i32, i32) {
    %c0_i32 = arith.constant 0 : i32
    %c0_i32_0 = arith.constant 0 : i32
    %c0_i32_1 = arith.constant 0 : i32
    return %c0_i32, %c0_i32_0 : i32, i32
  }
  func.func @transform_6(%arg0: i32) -> (i32, i32) {
    %c0_i32 = arith.constant 0 : i32
    %c0_i32_0 = arith.constant 0 : i32
    %c0_i32_1 = arith.constant 0 : i32
    return %c0_i32, %c0_i32_0 : i32, i32
  }
  func.func @transform_7(%arg0: i32) -> (i32, i32) {
    %c0_i32 = arith.constant 0 : i32
    %c0_i32_0 = arith.constant 0 : i32
    %c0_i32_1 = arith.constant 0 : i32
    return %c0_i32, %c0_i32_0 : i32, i32
  }
  func.func @transform_8(%arg0: i32) -> (i32, i32) {
    %c0_i32 = arith.constant 0 : i32
    %c0_i32_0 = arith.constant 0 : i32
    %c0_i32_1 = arith.constant 0 : i32
    return %c0_i32, %c0_i32_0 : i32, i32
  }
  func.func @transform_9(%arg0: i32) -> (i32, i32) {
    %c0_i32 = arith.constant 0 : i32
    %c0_i32_0 = arith.constant 0 : i32
    %c0_i32_1 = arith.constant 0 : i32
    return %c0_i32, %c0_i32_0 : i32, i32
  }
  func.func @transform_10(%arg0: i32) -> (i32, i32) {
    %c0_i32 = arith.constant 0 : i32
    %c0_i32_0 = arith.constant 0 : i32
    %c0_i32_1 = arith.constant 0 : i32
    return %c0_i32, %c0_i32_0 : i32, i32
  }
  func.func @transform_11(%arg0: i32) -> (i32, i32) {
    %c0_i32 = arith.constant 0 : i32
    %c0_i32_0 = arith.constant 0 : i32
    %c0_i32_1 = arith.constant 0 : i32
    return %c0_i32, %c0_i32_0 : i32, i32
  }
  func.func @transform_12(%arg0: i32) -> (i32, i32) {
    %c0_i32 = arith.constant 0 : i32
    %c0_i32_0 = arith.constant 0 : i32
    %c0_i32_1 = arith.constant 0 : i32
    return %c0_i32, %c0_i32_0 : i32, i32
  }
  func.func @transform_13(%arg0: i32) -> (i32, i32) {
    %c0_i32 = arith.constant 0 : i32
    %c0_i32_0 = arith.constant 0 : i32
    %c0_i32_1 = arith.constant 0 : i32
    return %c0_i32, %c0_i32_0 : i32, i32
  }
  func.func @transform_14(%arg0: i32) -> (i32, i32) {
    %c0_i32 = arith.constant 0 : i32
    %c0_i32_0 = arith.constant 0 : i32
    %c0_i32_1 = arith.constant 0 : i32
    return %c0_i32, %c0_i32_0 : i32, i32
  }
  func.func @transform_15(%arg0: i32) -> (i32, i32) {
    %c0_i32 = arith.constant 0 : i32
    %c0_i32_0 = arith.constant 0 : i32
    %c0_i32_1 = arith.constant 0 : i32
    return %c0_i32, %c0_i32_0 : i32, i32
  }
  func.func @transform_16(%arg0: i32) -> (i32, i32, i32) {
    %c0_i32 = arith.constant 0 : i32
    %c0_i32_0 = arith.constant 0 : i32
    %c0_i32_1 = arith.constant 0 : i32
    return %arg0, %c0_i32, %c0_i32_0 : i32, i32, i32
  }
}

</mosaic_0001>

<bundles_post_ra>
// kernel: tpu_custom_call.1
= control target key start
LH: loop header
LB: loop body
LE: loop exit
PB: predicated region body
PF: predicated region fallthrough
CT: control target
= control target key end

     0   :  { %s3580_s0 = inlined_call_operand.vmem [shape: f32[2,16,64], index: 0, kind: input, shape index: {}]   ;;  %s3581_s1 = inlined_call_operand.hbm [shape: f32[1,64], index: 1, kind: input, shape index: {}]   ;;  %s3582_s2 = inlined_call_operand.hbm [shape: f32[1,64], index: 2, kind: input, shape index: {}]   ;;  %s3583_s3 = inlined_call_operand.hbm [shape: f32[576,128], index: 3, kind: input, shape index: {}]   ;;  %s3584_s4 = inlined_call_operand.hbm [shape: f32[1,128], index: 4, kind: input, shape index: {}]   ;;  %s3585_s5 = inlined_call_operand.hbm [shape: f32[1,128], index: 5, kind: input, shape index: {}]   ;;  %s3586_s6 = inlined_call_operand.hbm [shape: f32[1152,128], index: 6, kind: input, shape index: {}]   ;;  %s3587_s7 = inlined_call_operand.hbm [shape: f32[1,64], index: 7, kind: input, shape index: {}]   ;;  %s3588_s8 = inlined_call_operand.hbm [shape: f32[1,64], index: 8, kind: input, shape index: {}]   ;;  %s3589_s9 = inlined_call_operand.hbm [shape: f32[64,128], index: 9, kind: input, shape index: {}]   ;;  %s3590_s10 = inlined_call_operand.vmem [shape: f32[8,128], index: 10, kind: input, shape index: {}]   ;;  %s3591_s11 = inlined_call_operand.vmem [shape: f32[8,4], index: 11, kind: input, shape index: {}]   ;;  %s3592_s12 = inlined_call_operand.hbm [shape: f32[1,4], index: 12, kind: input, shape index: {}]   ;;  %s3593_s13 = inlined_call_operand.vmem [shape: f32[8,4], index: 13, kind: input, shape index: {}]   ;;  %s3594_s14 = inlined_call_operand.vmem [shape: f32[8,1], index: 14, kind: input, shape index: {}]   ;;  %s3595_s15 = inlined_call_operand.vmem [shape: f32[8,128], index: 15, kind: input, shape index: {}]   ;;  %s3596_s16 = inlined_call_operand.hbm [shape: f32[2,16,128], index: 16, kind: output, shape index: {}]  }
   0x1   :  { %3609 = sst [smem:[#allocation37_spill]] %s3580_s0 }
   0x2   :  { %3610 = sst [smem:[#allocation38_spill]] %s3582_s2 }
   0x3   :  { %3611 = sst [smem:[#allocation39_spill]] %s3584_s4 }
   0x4   :  { %21 = vsyncpa [#allocation7], 0 }
   0x5   :  { %22 = vsyncpa [#allocation10], 0 }
   0x6   :  { %23 = vsyncpa [#allocation13], 0 }
   0x7   :  { %24 = vsyncpa [#allocation16], 0 }
   0x8   :  { %25 = vsyncpa [#allocation19], 0 }
   0x9   :  { %26 = vsyncpa [#allocation22], 0 }
   0xa   :  { %27 = vsyncpa [#allocation8], 0 }
   0xb   :  { %29 = vsyncpa [#allocation8 + $0x1], 0  ;;  %s3210_s21 = smov 0   ;;  %s3212_s22 = smov 0  }
   0xc   :  { %s3214_s23 = smov 0   ;;  %s3216_s24 = smov 0  }
   0xd LB: > { %3612 = sst [smem:[#allocation31_spill]] %s3087_s21  ;;  %s3231_s25 = sadd.s32 4294967295, %s3099_s24   ;;  %s3099_s24 = sphi %s3216_s24, %s3646_s24   ;;  %s3095_s23 = sphi %s3214_s23, %s3648_s23   ;;  %s3091_s22 = sphi %s3212_s22, %s3650_s22   ;;  %s3087_s21 = sphi %s3210_s21, %s3649_s21  }
   0xe   : > { %3613 = sst [smem:[#allocation32_spill]] %s3095_s23  ;;  %s2152_s26 = sadd.s32 4294967294, %s3099_s24  }
   0xf   : > { %3614 = sst [smem:[#allocation33_spill]] %s3099_s24  ;;  %s3235_s27 = sadd.s32 1, %s3099_s24  }
  0x10   : > { %3615 = sst [smem:[#allocation34_spill]] %s3235_s27  ;;  %s383_s28 = sadd.s32 1, %s3095_s23 }
  0x11   : > { %s380_s29 = ssub.s32 %s3099_s24, %s3235_s27  ;;  %p393_p0 = scmp.ne.s32.totalorder %s3095_s23, %s3091_s22 }
  0x12   : > { %p381_p1 = scmp.eq.s32.totalorder %s380_s29, 0  ;;  %p394_p2 = scmp.eq.s32.totalorder %s3231_s25, 1 }
  0x13   : > { %p399_p3 = scmp.ne.s32.totalorder %s3091_s22, %s3087_s21  ;;  %p400_p4 = scmp.eq.s32.totalorder %s2152_s26, 1 }
  0x14   : > { %s3246_s30 = scalar_select %p381_p1, %s3095_s23, %s383_s28  }
  0x15   : > { %p3248_p5 = por %p394_p2, %p393_p0  ;;  %p3252_p6 = por %p400_p4, %p399_p3 }
  0x16   : > { %3616 = sst [smem:[#allocation35_spill]] %s3246_s30  ;;  %p2153_p7 = scmp.ge.s32.totalorder %s3099_s24, 1 }
  0x17   : > { %s3617_s0 = scalar_select %p3248_p5, 1, 0 }
  0x18   : > { %s3618_s17 = scalar_select %p3252_p6, 1, 0 }
  0x19   : > { %p407_p8 = scmp.lt.s32.totalorder %s3099_s24, 3  ;;  %p3602_p9 = scmp.eq.s32.totalorder %s3231_s25, 0 }
  0x1a   : > { %3619 = sst [smem:[#allocation36_spill]] %s3618_s17  ;;  %s3101_s19 = smov [#allocation9]  }
  0x1b   : > { %p3259_p10 = pnand %p2153_p7, %p407_p8  ;;  %s431_s20 = sshll.u32 %s3101_s19, 4  ;;  %s432_s20 = int_to_ptr.vmem [resolvable:$true] %s431_s20 }
  0x1c   : > { %s3102_s26 = smov [#allocation12]   ;;  %s3103_s30 = smov [#allocation15]  }
  0x1d   : > { %s3620_s18 = scalar_select %p3259_p10, 1, 0 }
  0x1e   : > { %p2577_p11 = pneg %p3259_p10  ;;  %s455_s28 = sshll.u32 %s3102_s26, 4  ;;  %s456_s28 = int_to_ptr.vmem [resolvable:$true] %s455_s28 }
  0x1f   : > { %s476_s23 = sshll.u32 %s3103_s30, 4  ;;  %s2766_s19 = scalar_lea.vmem %s432_s20, 16  ;;  %s477_s23 = int_to_ptr.vmem [resolvable:$true] %s476_s23 }
  0x20   : > { %p3267_p12 = pnand %p3602_p9, %p2577_p11  ;;  %p2767_p0 = scmp.ne.s32.totalorder %s432_s20, %s2766_s19 }
  0x21   : > { %s2773_s26 = scalar_lea.vmem %s432_s20, 32  ;;  %p2774_p3 = scmp.lt.s32.totalorder %s432_s20, %s432_s20 }
  0x22   : > { %p3273_p13 = pneg %p3267_p12  ;;  %p2775_p4 = scmp.lt.s32.totalorder %s2773_s26, %s2766_s19 }
  0x24   : > { %p2769_p1 = pnand %p2767_p0, %p3273_p13  ;;  %p2776_p7 = por %p2775_p4, %p2774_p3 }
  0x26   : > { %p2770_p2 = pneg %p2769_p1 }
  0x28   : > { %p2777_p8 = pnand %p2776_p7, %p2770_p2 }
  0x2a   : > { %2780 = shalt.err (!%p2777_p8)
}
  0x2b   : > { %s3623_s2 = sld [smem:[#allocation38_spill]]  ;;  %s2792_s21 = scalar_lea.vmem %s456_s28, 16 }
  0x2c   : > { %p2793_p11 = scmp.ne.s32.totalorder %s456_s28, %s2792_s21  ;;  %s2799_s24 = scalar_lea.vmem %s456_s28, 32 }
  0x2d   : > { %p2800_p0 = scmp.lt.s32.totalorder %s456_s28, %s456_s28  ;;  %p2801_p1 = scmp.lt.s32.totalorder %s2799_s24, %s2792_s21 }
  0x2e   : > { %p2795_p9 = pnand %p2793_p11, %p3273_p13 }
  0x2f   : > { %p2802_p5 = por %p2801_p1, %p2800_p0 }
  0x30   : > { %p2796_p6 = pneg %p2795_p9 }
  0x31   : > { %2583 = dma.hbm_to_vmem [thread:$0]  (!%p3267_p12), %s3623_s2, 16, %s432_s20, [#allocation10]  }
  0x32   : > { %p2803_p10 = pnand %p2802_p5, %p2796_p6 }
  0x34   : > { %2806 = shalt.err (!%p2803_p10)
}
  0x35   : > { %s3624_s4 = sld [smem:[#allocation39_spill]]  ;;  %s2818_s17 = scalar_lea.vmem %s477_s23, 18432 }
  0x36   : > { %p2819_p2 = scmp.ne.s32.totalorder %s477_s23, %s2818_s17  ;;  %p2826_p9 = scmp.lt.s32.totalorder %s477_s23, %s477_s23 }
  0x37   : > { %p2827_p7 = scmp.lt.s32.totalorder %s2818_s17, %s2818_s17 }
  0x38   : > { %p2821_p3 = pnand %p2819_p2, %p3273_p13 }
  0x39   : > { %p2828_p8 = por %p2827_p7, %p2826_p9 }
  0x3a   : > { %p2822_p4 = pneg %p2821_p3 }
  0x3b   : > { %2589 = dma.hbm_to_vmem [thread:$0]  (!%p3267_p12), %s3624_s4, 16, %s456_s28, [#allocation13]  }
  0x3c   : > { %p2829_p11 = pnand %p2828_p8, %p2822_p4 }
  0x3e   : > { %2832 = shalt.err (!%p2829_p11)
}
  0x3f   : > { %s3606_s21 = smov 128   ;;  %s3608_s24 = smov 8  }
  0x40   : > { %2595 = dma.hbm_to_vmem [thread:$0]  (!%p3267_p12), %s3586_s6, 18432, %s477_s23, [#allocation16], %s3606_s21, %s3606_s21, %s3608_s24  }
  0x41   : > { %s3106_s30 = smov [#allocation18]   ;;  %s3107_s26 = smov [#allocation6]  }
  0x42   : > { %s501_s19 = sshll.u32 %s3106_s30, 4  ;;  %s420_s17 = sshll.u32 %s3107_s26, 4  ;;  %s502_s19 = int_to_ptr.vmem [resolvable:$true] %s501_s19  ;;  %s421_s17 = int_to_ptr.vmem [resolvable:$true] %s420_s17 }
  0x43   : > { %s2844_s2 = scalar_lea.vmem %s502_s19, 16  ;;  %s2851_s4 = scalar_lea.vmem %s502_s19, 32 }
  0x44   : > { %p2845_p5 = scmp.ne.s32.totalorder %s502_s19, %s2844_s2  ;;  %p2852_p0 = scmp.lt.s32.totalorder %s502_s19, %s502_s19 }
  0x45   : > { %p2853_p1 = scmp.lt.s32.totalorder %s2851_s4, %s2844_s2 }
  0x46   : > { %p2847_p6 = pnand %p2845_p5, %p3273_p13 }
  0x47   : > { %p2854_p2 = por %p2853_p1, %p2852_p0 }
  0x48   : > { %p2848_p10 = pneg %p2847_p6 }
  0x4a   : > { %p2855_p3 = pnand %p2854_p2, %p2848_p10 }
  0x4c   : > { %2858 = shalt.err (!%p2855_p3)
}
  0x4d   : > { %2601 = dma.hbm_to_vmem [thread:$0]  (!%p3267_p12), %s3588_s8, 16, %s502_s19, [#allocation19]  }
  0x4e   : > { %s2870_s28 = scalar_lea.vmem %s421_s17, 16  ;;  %s2877_s30 = scalar_lea.vmem %s421_s17, 32 }
  0x4f   : > { %p2871_p4 = scmp.ne.s32.totalorder %s421_s17, %s2870_s28  ;;  %p2878_p8 = scmp.lt.s32.totalorder %s421_s17, %s421_s17 }
  0x50   : > { %p2879_p11 = scmp.lt.s32.totalorder %s2877_s30, %s2870_s28 }
  0x51   : > { %p2873_p9 = pnand %p2871_p4, %p3273_p13 }
  0x52   : > { %p2880_p5 = por %p2879_p11, %p2878_p8 }
  0x53   : > { %p2874_p7 = pneg %p2873_p9 }
  0x55   : > { %p2881_p6 = pnand %p2880_p5, %p2874_p7 }
  0x57   : > { %2884 = shalt.err (!%p2881_p6)
}
  0x58   : > { %2580 = dma.hbm_to_vmem [thread:$0]  (!%p3267_p12), %s3581_s1, 16, %s421_s17, [#allocation7]  }
  0x59   : > { %s3108_s19 = smov [#allocation11]   ;;  %s3109_s20 = smov [#allocation14]  }
  0x5a   : > { %s441_s26 = sshll.u32 %s3108_s19, 4  ;;  %s466_s23 = sshll.u32 %s3109_s20, 4  ;;  %s442_s26 = int_to_ptr.vmem [resolvable:$true] %s441_s26  ;;  %s467_s23 = int_to_ptr.vmem [resolvable:$true] %s466_s23 }
  0x5b   : > { %s2896_s21 = scalar_lea.vmem %s442_s26, 9216  ;;  %p2904_p2 = scmp.lt.s32.totalorder %s442_s26, %s442_s26 }
  0x5c   : > { %p2897_p10 = scmp.ne.s32.totalorder %s442_s26, %s2896_s21  ;;  %p2905_p3 = scmp.lt.s32.totalorder %s2896_s21, %s2896_s21 }
  0x5e   : > { %p2899_p0 = pnand %p2897_p10, %p3273_p13  ;;  %p2906_p4 = por %p2905_p3, %p2904_p2 }
  0x60   : > { %p2900_p1 = pneg %p2899_p0 }
  0x62   : > { %p2907_p9 = pnand %p2906_p4, %p2900_p1 }
  0x64   : > { %2910 = shalt.err (!%p2907_p9)
}
  0x65   : > { %s3625_s28 = smov 128   ;;  %s2922_s2 = scalar_lea.vmem %s467_s23, 16 }
  0x66   : > { %2586 = dma.hbm_to_vmem [thread:$0]  (!%p3267_p12), %s3583_s3, 9216, %s442_s26, [#allocation10], %s3625_s28, %s3625_s28, %s3608_s24  }
  0x67   : > { %p2923_p7 = scmp.ne.s32.totalorder %s467_s23, %s2922_s2  ;;  %s2929_s21 = scalar_lea.vmem %s467_s23, 32 }
  0x68   : > { %p2930_p5 = scmp.lt.s32.totalorder %s467_s23, %s467_s23  ;;  %p2931_p6 = scmp.lt.s32.totalorder %s2929_s21, %s2922_s2 }
  0x69   : > { %p2925_p8 = pnand %p2923_p7, %p3273_p13 }
  0x6a   : > { %p2932_p10 = por %p2931_p6, %p2930_p5 }
  0x6b   : > { %p2926_p11 = pneg %p2925_p8 }
  0x6d   : > { %p2933_p0 = pnand %p2932_p10, %p2926_p11 }
  0x6f   : > { %2936 = shalt.err (!%p2933_p0)
}
  0x70   : > { %2592 = dma.hbm_to_vmem [thread:$0]  (!%p3267_p12), %s3585_s5, 16, %s467_s23, [#allocation13]  }
  0x71   : > { %s3110_s26 = smov [#allocation17]   ;;  %s3111_s17 = smov [#allocation20]  }
  0x72   : > { %s490_s20 = sshll.u32 %s3110_s26, 4  ;;  %s511_s30 = sshll.u32 %s3111_s17, 4  ;;  %s491_s20 = int_to_ptr.vmem [resolvable:$true] %s490_s20  ;;  %s512_s30 = int_to_ptr.vmem [resolvable:$true] %s511_s30 }
  0x73   : > { %s2948_s24 = scalar_lea.vmem %s491_s20, 16  ;;  %s2955_s2 = scalar_lea.vmem %s491_s20, 32 }
  0x74   : > { %p2949_p1 = scmp.ne.s32.totalorder %s491_s20, %s2948_s24  ;;  %p2956_p4 = scmp.lt.s32.totalorder %s491_s20, %s491_s20 }
  0x75   : > { %p2957_p9 = scmp.lt.s32.totalorder %s2955_s2, %s2948_s24 }
  0x76   : > { %p2951_p2 = pnand %p2949_p1, %p3273_p13 }
  0x77   : > { %p2958_p7 = por %p2957_p9, %p2956_p4 }
  0x78   : > { %p2952_p3 = pneg %p2951_p2 }
  0x7a   : > { %p2959_p8 = pnand %p2958_p7, %p2952_p3 }
  0x7c   : > { %2962 = shalt.err (!%p2959_p8)
}
  0x7d   : > { %2598 = dma.hbm_to_vmem [thread:$0]  (!%p3267_p12), %s3587_s7, 16, %s491_s20, [#allocation16]  }
  0x7e   : > { %s2974_s4 = scalar_lea.vmem %s512_s30, 1024  ;;  %p2982_p10 = scmp.lt.s32.totalorder %s512_s30, %s512_s30 }
  0x7f   : > { %p2975_p11 = scmp.ne.s32.totalorder %s512_s30, %s2974_s4  ;;  %p2983_p0 = scmp.lt.s32.totalorder %s2974_s4, %s2974_s4 }
  0x81   : > { %p2977_p5 = pnand %p2975_p11, %p3273_p13  ;;  %p2984_p1 = por %p2983_p0, %p2982_p10 }
  0x83   : > { %p2978_p6 = pneg %p2977_p5 }
  0x85   : > { %p2985_p2 = pnand %p2984_p1, %p2978_p6 }
  0x87   : > { %2988 = shalt.err (!%p2985_p2)
}
  0x88   : > { %s3626_s24 = smov 8   ;;  %s3112_s20 = smov [#allocation21]  }
  0x89   : > { %2604 = dma.hbm_to_vmem [thread:$0]  (!%p3267_p12), %s3589_s9, 1024, %s512_s30, [#allocation19], %s3625_s28, %s3625_s28, %s3626_s24  }
  0x8a   : > { %s531_s17 = sshll.u32 %s3112_s20, 4  ;;  %s532_s17 = int_to_ptr.vmem [resolvable:$true] %s531_s17 }
  0x8b   : > { %s3000_s2 = scalar_lea.vmem %s532_s17, 16  ;;  %s3007_s21 = scalar_lea.vmem %s532_s17, 32 }
  0x8c   : > { %p3001_p3 = scmp.ne.s32.totalorder %s532_s17, %s3000_s2  ;;  %p3008_p7 = scmp.lt.s32.totalorder %s532_s17, %s532_s17 }
  0x8d   : > { %p3009_p8 = scmp.lt.s32.totalorder %s3007_s21, %s3000_s2 }
  0x8e   : > { %p3003_p4 = pnand %p3001_p3, %p3273_p13 }
  0x8f   : > { %p3010_p11 = por %p3009_p8, %p3008_p7 }
  0x90   : > { %p3004_p9 = pneg %p3003_p4 }
  0x92   : > { %p3011_p5 = pnand %p3010_p11, %p3004_p9 }
  0x94   : > { %3014 = shalt.err (!%p3011_p5)
}
  0x95   : > { %2607 = dma.hbm_to_vmem [thread:$0]  (!%p3267_p12), %s3592_s12, 16, %s532_s17, [#allocation22]  }
  0x96   : > { %p3627_p6 = scmp.ne.s32.totalorder %s3620_s18, 0 }
  0x97   : > { %p3628_p10 = scmp.eq.s32.totalorder (!%p3627_p6), %s3231_s25, 0 }
  0x98   : > { %561 = sbr.rel (%p3627_p6) target bundleno = 1686 (0x696), region = 84 }
  0x9d   : > { %3058 = dma.done.wait (%p3628_p10), [#allocation7], 16   ;;  %p3629_p13 = pmov %p3628_p10 }
  0x9e   : > { %p3630_p0 = pmov %p3628_p10 }
  0x9f   : > { %3060 = vsyncadd (%p3629_p13), [#allocation7], 4294967280 }
  0xa0   : > { %3062 = dma.done.wait (%p3630_p0), [#allocation10], 9232   ;;  %p3631_p1 = pmov %p3630_p0 }
  0xa1   : > { %p3632_p2 = pmov %p3630_p0 }
  0xa2   : > { %3064 = vsyncadd (%p3631_p1), [#allocation10], 4294958064 }
  0xa3   : > { %3066 = dma.done.wait (%p3632_p2), [#allocation13], 32   ;;  %p3633_p12 = pmov %p3630_p0 }
  0xa4   : > { %p3634_p3 = pmov %p3630_p0 }
  0xa5   : > { %3068 = vsyncadd (%p3633_p12), [#allocation13], 4294967264 }
  0xa6   : > { %3070 = dma.done.wait (%p3634_p3), [#allocation16], 18448   ;;  %p3635_p4 = pmov %p3630_p0 }
  0xa7   : > { %p3636_p9 = pmov %p3630_p0 }
  0xa8   : > { %3072 = vsyncadd (%p3635_p4), [#allocation16], 4294948848 }
  0xa9   : > { %3074 = dma.done.wait (%p3636_p9), [#allocation19], 1040   ;;  %p3637_p7 = pmov %p3630_p0 }
  0xaa   : > { %p3638_p8 = pmov %p3630_p0 }
  0xab   : > { %3076 = vsyncadd (%p3637_p7), [#allocation19], 4294966256 }
  0xac   : > { %3078 = dma.done.wait (%p3638_p8), [#allocation22], 16   ;;  %p3639_p11 = pmov %p3630_p0 }
  0xad   : > { %p647_p5 = scmp.lt.s32.totalorder %s3231_s25, 1  ;;  %vm674_vm0 = vcmask 588800   ;;  %v3113_v0 = vmov 0.0   ;;  %vm677_vm1 = vcmask 582656   ;;  %s3640_s30 = sld [smem:[#allocation37_spill]]  ;;  %v813_v11 = vld [vmem:[#allocation11 + $0xf8] sm:$0xff] }
  0xae   : > { %3080 = vsyncadd (%p3639_p11), [#allocation22], 4294967280  ;;  %675 = vst.msk [vmem:[#allocation2] sm:$0xff] %vm674_vm0, %v3113_v0  ;;  %v2179_v3 = vld [vmem:[#allocation6] ss:$0 sm:$0xff]  ;;  %s3114_s19 = smov 4   ;;  %2196 = vmatprep.subr.mxu0 %v813_v11 }
  0xaf   : > { %676 = vst.msk [vmem:[#allocation2 + $0x8] sm:$0xff] %vm674_vm0, %v3113_v0  ;;  %1105 = vst [vmem:[#allocation4] sm:$0xff] %v3113_v0  ;;  %s648_s27 = scalar_select %p647_p5, %s3231_s25, 1  ;;  %v2180_v6 = vld [vmem:[#allocation9] ss:$0 sm:$0xff]  ;;  %v812_v13 = vld [vmem:[#allocation11 + $0xf0] sm:$0xff] }
  0xb0   : > { %1108 = vst [vmem:[#allocation4 + $0x10] sm:$0xff] %v3113_v0  ;;  %1110 = vst [vmem:[#allocation4 + $0x20] sm:$0x3] %v3113_v0  ;;  %v797_v12 = vld [vmem:[#allocation11 + $0x78] sm:$0xff]  ;;  %v796_v14 = vld [vmem:[#allocation11 + $0x70] sm:$0xff]  ;;  %vm687_vm2 = vcmask 556064  }
  0xb1   : > { %678 = vst.msk [vmem:[#allocation2 + $0x10] sm:$0x3] %vm677_vm1, %v3113_v0  ;;  %s2194_s18 = sshll.u32 %s648_s27, 4  ;;  %2197 = vmatpush3.msra.mxu0 %v797_v12  ;;  %v811_v15 = vld [vmem:[#allocation11 + $0xe8] sm:$0xff]  ;;  %v810_v17 = vld [vmem:[#allocation11 + $0xe0] sm:$0xff]  ;;  %v845_v18 = vld [vmem:[#allocation11 + $0x1f8] sm:$0xff] }
  0xb2   : > { %2198 = vmatprep.subr.mxu0 %v812_v13  ;;  %v795_v16 = vld [vmem:[#allocation11 + $0x68] sm:$0xff]  ;;  %v794_v19 = vld [vmem:[#allocation11 + $0x60] sm:$0xff]  ;;  %2234 = vmatprep.subr.mxu1 %v845_v18  ;;  %v829_v20 = vld [vmem:[#allocation11 + $0x178] sm:$0xff]  ;;  %vm693_vm3 = vcmask 523264   ;;  %s3115_s26 = smov 60   ;;  %s3116_s20 = smov 120  }
  0xb3   : > { %s3393_s24 = scalar_lea.vmem %s3640_s30, %s2194_s18  ;;  %2199 = vmatpush3.msra.mxu0 %v796_v14  ;;  %v844_v21 = vld [vmem:[#allocation11 + $0x1f0] sm:$0xff]  ;;  %v809_v22 = vld [vmem:[#allocation11 + $0xd8] sm:$0xff]  ;;  %2235 = vmatpush3.msra.mxu1 %v829_v20  ;;  %v807_v27 = vld [vmem:[#allocation11 + $0xc8] sm:$0xff]  ;;  %vm716_vm4 = vcmask 1046528   ;;  %vm746_vm5 = vcmask 1045504   ;;  %s3117_s17 = smov 64  }
  0xb4   : > { %v652_v1 = vld [vmem:[%s3393_s24] sm:$0xff]  ;;  %v653_v2 = vld [vmem:[%s3393_s24 + $0x8] sm:$0xff]  ;;  %2200 = vmatprep.subr.mxu0 %v811_v15  ;;  %v793_v24 = vld [vmem:[#allocation11 + $0x58] sm:$0xff]  ;;  %2236 = vmatprep.subr.mxu1 %v844_v21  ;;  %s3118_s2 = smov 56   ;;  %s3119_s21 = smov 124   ;;  %vm704_vm6 = vcmask 1048064  }
  0xb5   : > { %v661_v4 = vmul.f32 %v2179_v3, %v652_v1  ;;  %v662_v5 = vmul.f32 %v2179_v3, %v653_v2  ;;  %2201 = vmatpush3.msra.mxu0 %v795_v16  ;;  %v828_v23 = vld [vmem:[#allocation11 + $0x170] sm:$0xff]  ;;  %v791_v28 = vld [vmem:[#allocation11 + $0x48] sm:$0xff]  ;;  %v806_v29 = vld [vmem:[#allocation11 + $0xc0] sm:$0xff]  ;;  %vm1106_vm7 = vcmask 130048   ;;  %vm1111_vm8 = vcmask 123904   ;;  %s3120_s23 = smov 8  }
  0xb6   : > { %2202 = vmatprep.subr.mxu0 %v810_v17  ;;  %v808_v25 = vld [vmem:[#allocation11 + $0xd0] sm:$0xff]  ;;  %2237 = vmatpush3.msra.mxu1 %v828_v23  ;;  %v790_v30 = vld [vmem:[#allocation11 + $0x40] sm:$0xff]  ;;  %v805_v31 = vld [vmem:[#allocation11 + $0xb8] sm:$0xff]  ;;  %1107 = vst.msk [vmem:[#allocation4 + $0x8] sm:$0xff] %vm1106_vm7, %v3113_v0  ;;  %vm1115_vm9 = vcmask 1040384   ;;  %vm1128_vm10 = vcmask 1047617  }
  0xb7   : > { %v670_v7 = vadd.f32 %v2180_v6, %v661_v4  ;;  %v671_v8 = vadd.f32 %v2180_v6, %v662_v5  ;;  %2203 = vmatpush3.msra.mxu0 %v794_v19  ;;  %v792_v26 = vld [vmem:[#allocation11 + $0x50] sm:$0xff]  ;;  %v843_v32 = vld [vmem:[#allocation11 + $0x1e8] sm:$0xff]  ;;  %v789_v33 = vld [vmem:[#allocation11 + $0x38] sm:$0xff]  ;;  %1109 = vst.msk [vmem:[#allocation4 + $0x18] sm:$0xff] %vm1106_vm7, %v3113_v0  ;;  %vm1130_vm11 = vcmask 64513   ;;  %vm1136_vm12 = vcmask 1040448  }
  0xb8   : > { %2204 = vmatprep.subr.mxu0 %v809_v22  ;;  %2238 = vmatprep.subr.mxu1 %v843_v32  ;;  %v827_v34 = vld [vmem:[#allocation11 + $0x168] sm:$0xff]  ;;  %v804_v35 = vld [vmem:[#allocation11 + $0xb0] sm:$0xff]  ;;  %v842_v36 = vld [vmem:[#allocation11 + $0x1e0] sm:$0xff]  ;;  %1112 = vst.msk [vmem:[#allocation4 + $0x28] sm:$0x3] %vm1111_vm8, %v3113_v0  ;;  %vm1138_vm13 = vcmask 57344  }
  0xb9   : > { %v672_v9 = vmax.f32 %v670_v7, 0.0  ;;  %v673_v10 = vmax.f32 %v671_v8, 0.0  ;;  %2205 = vmatpush3.msra.mxu0 %v793_v24  ;;  %2239 = vmatpush3.msra.mxu1 %v827_v34  ;;  %v788_v37 = vld [vmem:[#allocation11 + $0x30] sm:$0xff]  ;;  %v826_v38 = vld [vmem:[#allocation11 + $0x160] sm:$0xff]  ;;  %v803_v39 = vld [vmem:[#allocation11 + $0xa8] sm:$0xff]  ;;  %vm1132_vm14 = vcmask 1047616  }
  0xba   : > { %2206 = vmatprep.subr.mxu0 %v808_v25  ;;  %2240 = vmatprep.subr.mxu1 %v842_v36  ;;  %v841_v40 = vld [vmem:[#allocation11 + $0x1d8] sm:$0xff]  ;;  %v787_v41 = vld [vmem:[#allocation11 + $0x28] sm:$0xff]  ;;  %v802_v43 = vld [vmem:[#allocation11 + $0xa0] sm:$0xff]  ;;  %vm1134_vm15 = vcmask 64512   ;;  %s3121_s4 = smov 112   ;;  %vm1160_vm0 = vcmask 982016  }
  0xbb   : > { %681 = vrot.lane.b32.xlu0 %v672_v9, %s3114_s19  ;;  %2207 = vmatpush3.msra.mxu0 %v792_v26  ;;  %v825_v42 = vld [vmem:[#allocation11 + $0x158] sm:$0xff]  ;;  %v840_v44 = vld [vmem:[#allocation11 + $0x1d0] sm:$0xff]  ;;  %v786_v46 = vld [vmem:[#allocation11 + $0x20] sm:$0xff]  ;;  %vm1175_vm1 = vcmask 916480   ;;  %s2195_s18 = sshll.u32 %s3231_s25, 8  ;;  %p3641_p10 = scmp.ne.s32.totalorder %s3617_s0, 0 }
  0xbc   : > { %2208 = vmatprep.subr.mxu0 %v807_v27  ;;  %2241 = vmatpush3.msra.mxu1 %v826_v38  ;;  %v824_v47 = vld [vmem:[#allocation11 + $0x150] sm:$0xff]  ;;  %v801_v48 = vld [vmem:[#allocation11 + $0x98] sm:$0xff]  ;;  %v839_v49 = vld [vmem:[#allocation11 + $0x1c8] sm:$0xff]  ;;  %s3537_s30 = scalar_lea.hbm %s3596_s16, %s2195_s18 }
  0xbd   : > { %2209 = vmatpush3.msra.mxu0 %v791_v28  ;;  %2242 = vmatprep.subr.mxu1 %v841_v40  ;;  %v785_v50 = vld [vmem:[#allocation11 + $0x18] sm:$0xff]  ;;  %v823_v52 = vld [vmem:[#allocation11 + $0x148] sm:$0xff]  ;;  %v800_v53 = vld [vmem:[#allocation11 + $0x90] sm:$0xff] }
  0xbe   : > { %2210 = vmatprep.subr.mxu0 %v806_v29  ;;  %2243 = vmatpush3.msra.mxu1 %v825_v42  ;;  %v838_v54 = vld [vmem:[#allocation11 + $0x1c0] sm:$0xff]  ;;  %v784_v55 = vld [vmem:[#allocation11 + $0x10] sm:$0xff]  ;;  %v799_v57 = vld [vmem:[#allocation11 + $0x88] sm:$0xff] }
  0xbf   : > { %683 = vrot.lane.b32.xlu0 %v673_v10, %s3114_s19  ;;  %2211 = vmatpush3.msra.mxu0 %v790_v30  ;;  %v822_v56 = vld [vmem:[#allocation11 + $0x140] sm:$0xff]  ;;  %v837_v58 = vld [vmem:[#allocation11 + $0x1b8] sm:$0xff]  ;;  %v783_v60 = vld [vmem:[#allocation11 + $0x8] sm:$0xff]  ;;  %s3123_s19 = smov [#allocation23]  }
  0xc0   : > { %2212 = vmatprep.subr.mxu0 %v805_v31  ;;  %2244 = vmatprep.subr.mxu1 %v840_v44  ;;  %v821_v61 = vld [vmem:[#allocation11 + $0x138] sm:$0xff]  ;;  %v798_v62 = vld [vmem:[#allocation11 + $0x80] sm:$0xff]  ;;  %v836_v63 = vld [vmem:[#allocation11 + $0x1b0] sm:$0xff] }
  0xc1   : > { %2213 = vmatpush3.msra.mxu0 %v789_v33  ;;  %2245 = vmatpush3.msra.mxu1 %v824_v47  ;;  %v782_v1 = vld [vmem:[#allocation11] sm:$0xff]  ;;  %v820_v2 = vld [vmem:[#allocation11 + $0x130] sm:$0xff]  ;;  %v835_v3 = vld [vmem:[#allocation11 + $0x1a8] sm:$0xff] }
  0xc2   : > { %2214 = vmatprep.subr.mxu0 %v804_v35  ;;  %2246 = vmatprep.subr.mxu1 %v839_v49  ;;  %v3402_v4 = vld [vmem:[#allocation11 + $0x238] sm:$0xff]  ;;  %v819_v9 = vld [vmem:[#allocation11 + $0x128] sm:$0xff]  ;;  %v834_v14 = vld [vmem:[#allocation11 + $0x1a0] sm:$0xff] }
  0xc3   : > { %2215 = vmatpush3.msra.mxu0 %v788_v37  ;;  %2247 = vmatpush3.msra.mxu1 %v823_v52  ;;  %v818_v15 = vld [vmem:[#allocation11 + $0x120] sm:$0xff]  ;;  %v833_v20 = vld [vmem:[#allocation11 + $0x198] sm:$0xff]  ;;  %v832_v22 = vld [vmem:[#allocation11 + $0x190] sm:$0xff] }
  0xc4   : > { %2216 = vmatprep.subr.mxu0 %v803_v39  ;;  %2248 = vmatprep.subr.mxu1 %v838_v54  ;;  %v817_v21 = vld [vmem:[#allocation11 + $0x118] sm:$0xff]  ;;  %v816_v23 = vld [vmem:[#allocation11 + $0x110] sm:$0xff]  ;;  %v831_v24 = vld [vmem:[#allocation11 + $0x188] sm:$0xff] }
  0xc5   : > { %2217 = vmatpush3.msra.mxu0 %v787_v41  ;;  %2249 = vmatpush3.msra.mxu1 %v822_v56  ;;  %v815_v25 = vld [vmem:[#allocation11 + $0x108] sm:$0xff]  ;;  %v830_v26 = vld [vmem:[#allocation11 + $0x180] sm:$0xff]  ;;  %v852_v38 = vld [vmem:[#allocation11 + $0x230] sm:$0xff] }
  0xc6   : > { %2218 = vmatprep.subr.mxu0 %v802_v43  ;;  %2250 = vmatprep.subr.mxu1 %v837_v58  ;;  %v814_v27 = vld [vmem:[#allocation11 + $0x100] sm:$0xff]  ;;  %v851_v39 = vld [vmem:[#allocation11 + $0x228] sm:$0xff]  ;;  %v848_v49 = vld [vmem:[#allocation11 + $0x210] sm:$0xff] }
  0xc7   : > { %2219 = vmatpush3.msra.mxu0 %v786_v46  ;;  %2251 = vmatpush3.msra.mxu1 %v821_v61  ;;  %v850_v44 = vld [vmem:[#allocation11 + $0x220] sm:$0xff] }
  0xc8   : > { %2220 = vmatprep.subr.mxu0 %v801_v48  ;;  %2252 = vmatprep.subr.mxu1 %v836_v63  ;;  %v849_v48 = vld [vmem:[#allocation11 + $0x218] sm:$0xff] }
  0xc9   : > { %2221 = vmatpush3.msra.mxu0 %v785_v50  ;;  %2253 = vmatpush3.msra.mxu1 %v820_v2  ;;  %v1301_v0 = vld [vmem:[#allocation15 + $0x78] sm:$0xff] }
  0xca   : > { %2222 = vmatprep.subr.mxu0 %v800_v53  ;;  %2254 = vmatprep.subr.mxu1 %v835_v3  ;;  %v846_v53 = vld [vmem:[#allocation11 + $0x200] sm:$0xff] }
  0xcb   : > { %2223 = vmatpush3.msra.mxu0 %v784_v55  ;;  %2255 = vmatpush3.msra.mxu1 %v819_v9  ;;  %v2184_v9 = vld [vmem:[#allocation14] ss:$0 sm:$0xff] }
  0xcc   : > { %2224 = vmatprep.subr.mxu0 %v799_v57  ;;  %2256 = vmatprep.subr.mxu1 %v834_v14 }
  0xcd   : > { %2225 = vmatpush3.msra.mxu0 %v783_v60  ;;  %2257 = vmatpush3.msra.mxu1 %v818_v15 }
  0xce   : > { %2226 = vmatprep.subr.mxu0 %v798_v62  ;;  %2258 = vmatprep.subr.mxu1 %v833_v20 }
  0xcf   : > { %2227 = vmatpush3.msra.mxu0 %v782_v1  ;;  %2259 = vmatpush3.msra.mxu1 %v817_v21 }
  0xd0   : > { %2462 = vmatprep.subr.mxu0 %v3402_v4  ;;  %2260 = vmatprep.subr.mxu1 %v832_v22 }
  0xd1   : > { %2261 = vmatpush3.msra.mxu1 %v816_v23 }
  0xd2   : > { %2262 = vmatprep.subr.mxu1 %v831_v24 }
  0xd3   : > { %2263 = vmatpush3.msra.mxu1 %v815_v25  ;;  %v1349_v25 = vld [vmem:[#allocation15 + $0x1f8] sm:$0xff] }
  0xd4   : > { %2264 = vmatprep.subr.mxu1 %v830_v26  ;;  %v1317_v26 = vld [vmem:[#allocation15 + $0xf8] sm:$0xff] }
  0xd5   : > { %2265 = vmatpush3.msra.mxu1 %v814_v27  ;;  %v1333_v27 = vld [vmem:[#allocation15 + $0x178] sm:$0xff] }
  0xd6   : > { %2282 = vmatprep.subr.mxu1 %v1317_v26 }
 0x12d   : > { %v682_v45 = vpop.permute.xlu0 %681 }
 0x12e   : > { %688 = vst.msk [vmem:[#allocation2 + $0x1] sm:$0xff] %vm687_vm2, %v682_v45 }
 0x131   : > { %v684_v51 = vpop.permute.xlu0 %683 }
 0x132   : > { %689 = vst.msk [vmem:[#allocation2 + $0x9] sm:$0xff] %vm687_vm2, %v684_v51  ;;  %v847_v51 = vld [vmem:[#allocation11 + $0x208] sm:$0xff]  ;;  %vm1927_vm2 = vcmask 31744  }
 0x135   : > { %v690_v59 = vld [vmem:[#allocation2] sm:$0xff] }
 0x136   : > { %698 = vrot.lane.b32.xlu0 %v690_v59, %s3115_s26  ;;  %707 = vrot.lane.b32.xlu1 %v690_v59, %s3116_s20  ;;  %694 = vst.msk [vmem:[#allocation3] sm:$0xff] %vm693_vm3, %v690_v59  ;;  %v717_v7 = vrot.slane %v690_v59, 1  ;;  %v747_v8 = vrot.slane %v690_v59, 2 }
 0x139   : > { %v691_v5 = vld [vmem:[#allocation2 + $0x8] sm:$0xff]  ;;  %v692_v6 = vld [vmem:[#allocation2 + $0x10] sm:$0x3] }
 0x13a   : > { %v718_v10 = vrot.slane %v691_v5, 1  ;;  %v720_v11 = vrot.slane %v692_v6, 1  ;;  %v748_v12 = vrot.slane %v691_v5, 2  ;;  %695 = vst.msk [vmem:[#allocation3 + $0x28] sm:$0xff] %vm693_vm3, %v691_v5  ;;  %v750_v13 = vrot.slane %v692_v6, 2 }
 0x13c   : > { %v721_v16 = vsel %vm716_vm4, %v718_v10, %v720_v11  ;;  %v719_v17 = vsel %vm716_vm4, %v717_v7, %v718_v10  ;;  %v749_v18 = vsel %vm746_vm5, %v747_v8, %v748_v12  ;;  %v751_v19 = vsel %vm746_vm5, %v748_v12, %v750_v13  ;;  %v2183_v7 = vld [vmem:[#allocation12] ss:$0 sm:$0xff] }
 0x13d   : > { %724 = vrot.lane.b32.xlu0 %v721_v16, %s3117_s17  ;;  %722 = vrot.lane.b32.xlu1 %v719_v17, %s3117_s17  ;;  %754 = vst.msk [vmem:[#allocation3 + $0x18] sm:$0xff] %vm693_vm3, %v749_v18  ;;  %755 = vst.msk [vmem:[#allocation3 + $0x40] sm:$0xff] %vm693_vm3, %v751_v19 }
 0x141   : > { %756 = vrot.lane.b32.xlu0 %v749_v18, %s3115_s26  ;;  %709 = vrot.lane.b32.xlu1 %v691_v5, %s3116_s20 }
 0x145   : > { %738 = vrot.lane.b32.xlu0 %v719_v17, %s3118_s2  ;;  %700 = vrot.lane.b32.xlu1 %v691_v5, %s3115_s26 }
 0x149   : > { %766 = vrot.lane.b32.xlu0 %v751_v19, %s3116_s20  ;;  %730 = vrot.lane.b32.xlu1 %v719_v17, %s3119_s21 }
 0x14d   : > { %758 = vrot.lane.b32.xlu0 %v751_v19, %s3115_s26  ;;  %764 = vrot.lane.b32.xlu1 %v749_v18, %s3116_s20  ;;  %s3019_s26 = sshll.u32 %s3123_s19, 4  ;;  %s3020_s26 = int_to_ptr.vmem [resolvable:$false] %s3019_s26 }
 0x151   : > { %732 = vrot.lane.b32.xlu1 %v721_v16, %s3119_s21 }
 0x155   : > { %740 = vrot.lane.b32.xlu1 %v721_v16, %s3118_s2  ;;  %s644_s2 = sand.u32 1, %s3091_s22  }
 0x156   : > { %s2176_s21 = sshll.u32 %s644_s2, 4  ;;  %s3539_s25 = scalar_lea.sflag [#allocation8], %s644_s2 }
 0x1a8   : > { %v708_v28 = vpop.permute.xlu1 %707  ;;  %v699_v29 = vpop.permute.xlu0 %698 }
 0x1a9   : > { %713 = vst.msk [vmem:[#allocation3 + $0x8] sm:$0xff] %vm693_vm3, %v708_v28  ;;  %v1348_v28 = vld [vmem:[#allocation15 + $0x1f0] sm:$0xff] }
 0x1aa   : > { %705 = vst.msk [vmem:[#allocation3] sm:$0xff] %vm704_vm6, %v699_v29  ;;  %v1316_v29 = vld [vmem:[#allocation15 + $0xf0] sm:$0xff] }
 0x1af   : > { %v723_v30 = vpop.permute.xlu1 %722  ;;  %v725_v31 = vpop.permute.xlu0 %724 }
 0x1b0   : > { %728 = vst.msk [vmem:[#allocation3 + $0x8] sm:$0xff] %vm704_vm6, %v723_v30  ;;  %v1332_v30 = vld [vmem:[#allocation15 + $0x170] sm:$0xff] }
 0x1b1   : > { %v772_v37 = vld [vmem:[#allocation3] sm:$0xff] }
 0x1b3   : > { %v710_v32 = vpop.permute.xlu1 %709  ;;  %v757_v33 = vpop.permute.xlu0 %756 }
 0x1b4   : > { %714 = vst.msk [vmem:[#allocation3 + $0x30] sm:$0xff] %vm693_vm3, %v710_v32  ;;  %v1347_v32 = vld [vmem:[#allocation15 + $0x1e8] sm:$0xff] }
 0x1b5   : > { %762 = vst.msk [vmem:[#allocation3 + $0x18] sm:$0xff] %vm704_vm6, %v757_v33  ;;  %729 = vst.msk [vmem:[#allocation3 + $0x30] sm:$0xff] %vm704_vm6, %v725_v31  ;;  %v1300_v31 = vld [vmem:[#allocation15 + $0x70] sm:$0xff]  ;;  %v1315_v33 = vld [vmem:[#allocation15 + $0xe8] sm:$0xff] }
 0x1b7   : > { %v701_v34 = vpop.permute.xlu1 %700  ;;  %v739_v35 = vpop.permute.xlu0 %738  ;;  %v773_v36 = vld [vmem:[#allocation3 + $0x8] sm:$0xff] }
 0x1b8   : > { %706 = vst.msk [vmem:[#allocation3 + $0x28] sm:$0xff] %vm704_vm6, %v701_v34  ;;  %924 = vmatprep.mubr.f32.mxu0 %v773_v36  ;;  %v1331_v34 = vld [vmem:[#allocation15 + $0x168] sm:$0xff]  ;;  %v1346_v36 = vld [vmem:[#allocation15 + $0x1e0] sm:$0xff] }
 0x1b9   : > { %925 = vmatmul.mubr.f32.vlgmr.msra.gmra.mxu0 %v772_v37  ;;  %v1314_v37 = vld [vmem:[#allocation15 + $0xe0] sm:$0xff] }
 0x1ba   : > { %2463 = vmatpush3.msra.mxu0 %v3402_v4 }
 0x1bb   : > { %v731_v40 = vpop.permute.xlu1 %730  ;;  %2464 = vmatprep.subr.mxu0 %v852_v38  ;;  %v767_v41 = vpop.permute.xlu0 %766 }
 0x1bc   : > { %v775_v42 = vld [vmem:[#allocation3 + $0x18] sm:$0xff]  ;;  %736 = vst.msk [vmem:[#allocation3 + $0x10] sm:$0xff] %vm693_vm3, %v731_v40  ;;  %771 = vst.msk [vmem:[#allocation3 + $0x48] sm:$0xff] %vm693_vm3, %v767_v41  ;;  %2465 = vmatpush3.msra.mxu0 %v852_v38  ;;  %v778_v43 = vld [vmem:[#allocation3 + $0x30] sm:$0xff] }
 0x1bd   : > { %999 = vmatprep.mubr.f32.mxu1 %v775_v42  ;;  %744 = vst.msk [vmem:[#allocation3 + $0x10] sm:$0xff] %vm704_vm6, %v739_v35  ;;  %929 = vmatprep.mubr.f32.mxu0 %v778_v43  ;;  %v1299_v35 = vld [vmem:[#allocation15 + $0x68] sm:$0xff]  ;;  %v1330_v38 = vld [vmem:[#allocation15 + $0x160] sm:$0xff]  ;;  %v1345_v40 = vld [vmem:[#allocation15 + $0x1d8] sm:$0xff] }
 0x1be   : > { %2466 = vmatprep.subr.mxu0 %v851_v39  ;;  %v1313_v41 = vld [vmem:[#allocation15 + $0xd8] sm:$0xff] }
 0x1bf   : > { %2467 = vmatpush3.msra.mxu0 %v851_v39  ;;  %v765_v45 = vpop.permute.xlu1 %764  ;;  %v759_v46 = vpop.permute.xlu0 %758  ;;  %v777_v47 = vld [vmem:[#allocation3 + $0x28] sm:$0xff]  ;;  %v1329_v42 = vld [vmem:[#allocation15 + $0x158] sm:$0xff] }
 0x1c0   : > { %2468 = vmatprep.subr.mxu0 %v850_v44  ;;  %770 = vst.msk [vmem:[#allocation3 + $0x20] sm:$0xff] %vm693_vm3, %v765_v45  ;;  %930 = vmatmul.mubr.f32.gmra.mxu0 %v777_v47  ;;  %v1298_v39 = vld [vmem:[#allocation15 + $0x60] sm:$0xff]  ;;  %v1297_v43 = vld [vmem:[#allocation15 + $0x58] sm:$0xff]  ;;  %v1312_v45 = vld [vmem:[#allocation15 + $0xd0] sm:$0xff] }
 0x1c1   : > { %763 = vst.msk [vmem:[#allocation3 + $0x40] sm:$0xff] %vm704_vm6, %v759_v46  ;;  %2469 = vmatpush3.msra.mxu0 %v850_v44  ;;  %v1344_v44 = vld [vmem:[#allocation15 + $0x1d0] sm:$0xff] }
 0x1c2   : > { %2470 = vmatprep.subr.mxu0 %v849_v48  ;;  %v1328_v46 = vld [vmem:[#allocation15 + $0x150] sm:$0xff] }
 0x1c3   : > { %2471 = vmatpush3.msra.mxu0 %v849_v48  ;;  %v733_v50 = vpop.permute.xlu1 %732  ;;  %v781_v57 = vld [vmem:[#allocation3 + $0x48] sm:$0xff]  ;;  %v1296_v47 = vld [vmem:[#allocation15 + $0x50] sm:$0xff]  ;;  %v1343_v48 = vld [vmem:[#allocation15 + $0x1c8] sm:$0xff] }
 0x1c4   : > { %737 = vst.msk [vmem:[#allocation3 + $0x38] sm:$0xff] %vm693_vm3, %v733_v50  ;;  %2472 = vmatprep.subr.mxu0 %v848_v49  ;;  %v774_v52 = vld [vmem:[#allocation3 + $0x10] sm:$0xff] }
 0x1c5   : > { %2473 = vmatpush3.msra.mxu0 %v848_v49  ;;  %1000 = vmatmul.mubr.f32.vlgmr.msra.gmra.mxu1 %v774_v52  ;;  %v1311_v49 = vld [vmem:[#allocation15 + $0xc8] sm:$0xff]  ;;  %v1342_v52 = vld [vmem:[#allocation15 + $0x1c0] sm:$0xff] }
 0x1c6   : > { %2474 = vmatprep.subr.mxu0 %v847_v51  ;;  %2283 = vmatpush3.msra.mxu1 %v1301_v0  ;;  %v1327_v50 = vld [vmem:[#allocation15 + $0x148] sm:$0xff] }
 0x1c7   : > { %2475 = vmatpush3.msra.mxu0 %v847_v51  ;;  %v741_v54 = vpop.permute.xlu1 %740  ;;  %v776_v56 = vld [vmem:[#allocation3 + $0x20] sm:$0xff]  ;;  %2284 = vmatprep.subr.mxu1 %v1316_v29  ;;  %v1295_v51 = vld [vmem:[#allocation15 + $0x48] sm:$0xff] }
 0x1c8   : > { %v780_v55 = vld [vmem:[#allocation3 + $0x40] sm:$0xff]  ;;  %745 = vst.msk [vmem:[#allocation3 + $0x38] sm:$0xff] %vm704_vm6, %v741_v54  ;;  %2476 = vmatprep.subr.mxu0 %v846_v53  ;;  %2478 = vmatprep.mubr.msk.f32.mxu0 %vm693_vm3, %v776_v56  ;;  %v1326_v54 = vld [vmem:[#allocation15 + $0x140] sm:$0xff] }
 0x1c9   : > { %1004 = vmatprep.mubr.f32.mxu1 %v780_v55  ;;  %2477 = vmatpush3.msra.mxu0 %v846_v53  ;;  %v1310_v53 = vld [vmem:[#allocation15 + $0xc0] sm:$0xff]  ;;  %v1341_v56 = vld [vmem:[#allocation15 + $0x1b8] sm:$0xff] }
 0x1ca   : > { %2479 = vmatmul.mubr.msk.f32.vlgmr.msra.gmra.mxu0 %vm693_vm3, %v781_v57  ;;  %2320 = vmatprep.subr.mxu0 %v1349_v25  ;;  %v1294_v55 = vld [vmem:[#allocation15 + $0x40] sm:$0xff]  ;;  %v1309_v57 = vld [vmem:[#allocation15 + $0xb8] sm:$0xff] }
 0x1cb   : > { %2321 = vmatpush3.msra.mxu0 %v1333_v27  ;;  %2285 = vmatpush3.msra.mxu1 %v1300_v31  ;;  %v1413_v25 = vld [vmem:[#allocation15 + $0x3f8] sm:$0xff] }
 0x1cc   : > { %2322 = vmatprep.subr.mxu0 %v1348_v28  ;;  %2286 = vmatprep.subr.mxu1 %v1315_v33  ;;  %v1381_v27 = vld [vmem:[#allocation15 + $0x2f8] sm:$0xff] }
 0x1cd   : > { %2323 = vmatpush3.msra.mxu0 %v1332_v30  ;;  %2287 = vmatpush3.msra.mxu1 %v1299_v35 }
 0x1ce   : > { %2324 = vmatprep.subr.mxu0 %v1347_v32  ;;  %2288 = vmatprep.subr.mxu1 %v1314_v37 }
 0x1cf   : > { %v779_v58 = vld [vmem:[#allocation3 + $0x38] sm:$0xff]  ;;  %2325 = vmatpush3.msra.mxu0 %v1331_v34  ;;  %2289 = vmatpush3.msra.mxu1 %v1298_v39 }
 0x1d0   : > { %1005 = vmatmul.mubr.f32.gmra.mxu1 %v779_v58  ;;  %2326 = vmatprep.subr.mxu0 %v1346_v36  ;;  %v1325_v58 = vld [vmem:[#allocation15 + $0x138] sm:$0xff] }
 0x1d1   : > { %2327 = vmatpush3.msra.mxu0 %v1330_v38  ;;  %2290 = vmatprep.subr.mxu1 %v1313_v41 }
 0x1d2   : > { %2328 = vmatprep.subr.mxu0 %v1345_v40  ;;  %2291 = vmatpush3.msra.mxu1 %v1297_v43 }
 0x1d3   : > { %2329 = vmatpush3.msra.mxu0 %v1329_v42  ;;  %2292 = vmatprep.subr.mxu1 %v1312_v45 }
 0x1d4   : > { %2330 = vmatprep.subr.mxu0 %v1344_v44  ;;  %2293 = vmatpush3.msra.mxu1 %v1296_v47 }
 0x1d5   : > { %2331 = vmatpush3.msra.mxu0 %v1328_v46  ;;  %2294 = vmatprep.subr.mxu1 %v1311_v49 }
 0x1d6   : > { %2332 = vmatprep.subr.mxu0 %v1343_v48  ;;  %2295 = vmatpush3.msra.mxu1 %v1295_v51 }
 0x1d7   : > { %2333 = vmatpush3.msra.mxu0 %v1327_v50  ;;  %2296 = vmatprep.subr.mxu1 %v1310_v53 }
 0x1d8   : > { %2334 = vmatprep.subr.mxu0 %v1342_v52  ;;  %2297 = vmatpush3.msra.mxu1 %v1294_v55 }
 0x1d9   : > { %2335 = vmatpush3.msra.mxu0 %v1326_v54  ;;  %2298 = vmatprep.subr.mxu1 %v1309_v57 }
 0x1da   : > { %2336 = vmatprep.subr.mxu0 %v1341_v56 }
 0x1db   : > { %2337 = vmatpush3.msra.mxu0 %v1325_v58 }
 0x279   : > { %v2228_v59 = vpop.f32.mrf.mxu0 }
 0x27b   : > { %v2229_v60 = vpop.f32.mrf.mxu0 }
 0x27c   : > { %v2230_v1 = vadd.f32 %v2229_v60, %v2228_v59  ;;  %v1293_v59 = vld [vmem:[#allocation15 + $0x38] sm:$0xff]  ;;  %v1340_v60 = vld [vmem:[#allocation15 + $0x1b0] sm:$0xff] }
 0x27d   : > { %2299 = vmatpush3.msra.mxu1 %v1293_v59  ;;  %2338 = vmatprep.subr.mxu0 %v1340_v60 }
 0x280   : > { %v2231_v61 = vpop.f32.mrf.mxu0 }
 0x282   : > { %v2232_v2 = vpop.f32.mrf.mxu0 }
 0x283   : > { %v2233_v14 = vadd.f32 %v2232_v2, %v2231_v61  ;;  %v1308_v61 = vld [vmem:[#allocation15 + $0xb0] sm:$0xff]  ;;  %v1307_v2 = vld [vmem:[#allocation15 + $0xa8] sm:$0xff] }
 0x284   : > { %2300 = vmatprep.subr.mxu1 %v1308_v61 }
 0x285   : > { %v2266_v62 = vpop.f32.mrf.mxu1 }
 0x287   : > { %v2267_v63 = vpop.f32.mrf.mxu1 }
 0x288   : > { %v2268_v3 = vadd.f32 %v2267_v63, %v2266_v62  ;;  %v1324_v62 = vld [vmem:[#allocation15 + $0x130] sm:$0xff] }
 0x289   : > { %v1292_v63 = vld [vmem:[#allocation15 + $0x30] sm:$0xff]  ;;  %2339 = vmatpush3.msra.mxu0 %v1324_v62 }
 0x28a   : > { %v2480_v4 = vpop.f32.mrf.mxu0  ;;  %v1002_v5 = vadd.f32 %v2268_v3, %v2230_v1  ;;  %v1339_v1 = vld [vmem:[#allocation15 + $0x1a8] sm:$0xff]  ;;  %2301 = vmatpush3.msra.mxu1 %v1292_v63 }
 0x28b   : > { %v1323_v3 = vld [vmem:[#allocation15 + $0x128] sm:$0xff]  ;;  %2340 = vmatprep.subr.mxu0 %v1339_v1  ;;  %2302 = vmatprep.subr.mxu1 %v1307_v2 }
 0x28c   : > { %v1076_v6 = vpop.f32.mrf.mxu0  ;;  %2341 = vmatpush3.msra.mxu0 %v1323_v3 }
 0x28d   : > { %v1077_v8 = vadd.f32 %v1076_v6, %v1002_v5  ;;  %v1338_v5 = vld [vmem:[#allocation15 + $0x1a0] sm:$0xff] }
 0x28e   : > { %v1306_v6 = vld [vmem:[#allocation15 + $0xa0] sm:$0xff]  ;;  %2342 = vmatprep.subr.mxu0 %v1338_v5 }
 0x28f   : > { %v1092_v10 = vmul.f32 %v2183_v7, %v1077_v8  ;;  %v1290_v8 = vld [vmem:[#allocation15 + $0x20] sm:$0xff] }
 0x290   : > { %v2269_v11 = vpop.f32.mrf.mxu1 }
 0x291   : > { %v1101_v12 = vadd.f32 %v2184_v9, %v1092_v10  ;;  %v1305_v10 = vld [vmem:[#allocation15 + $0x98] sm:$0xff] }
 0x292   : > { %v2270_v13 = vpop.f32.mrf.mxu1 }
 0x293   : > { %v2271_v15 = vadd.f32 %v2270_v13, %v2269_v11  ;;  %v1103_v16 = vmax.f32 %v1101_v12, 0.0  ;;  %v1321_v11 = vld [vmem:[#allocation15 + $0x118] sm:$0xff]  ;;  %v1336_v13 = vld [vmem:[#allocation15 + $0x190] sm:$0xff] }
 0x294   : > { %v1289_v12 = vld [vmem:[#allocation15 + $0x18] sm:$0xff] }
 0x295   : > { %v1007_v17 = vadd.f32 %v2271_v15, %v2233_v14  ;;  %v1116_v18 = vrot.slane %v1103_v16, 7  ;;  %v1304_v14 = vld [vmem:[#allocation15 + $0x90] sm:$0xff] }
 0x296   : > { %v1320_v15 = vld [vmem:[#allocation15 + $0x110] sm:$0xff] }
 0x297   : > { %v1082_v19 = vadd.f32 %v2480_v4, %v1007_v17  ;;  %1119 = vrot.lane.b32.xlu0 %v1116_v18, %s3120_s23  ;;  %v1291_v4 = vld [vmem:[#allocation15 + $0x28] sm:$0xff]  ;;  %v1288_v16 = vld [vmem:[#allocation15 + $0x10] sm:$0xff] }
 0x298   : > { %2303 = vmatpush3.msra.mxu1 %v1291_v4  ;;  %v1335_v17 = vld [vmem:[#allocation15 + $0x188] sm:$0xff]  ;;  %v1397_v4 = vld [vmem:[#allocation15 + $0x378] sm:$0xff] }
 0x299   : > { %v1093_v20 = vmul.f32 %v2183_v7, %v1082_v19  ;;  %v1322_v7 = vld [vmem:[#allocation15 + $0x120] sm:$0xff]  ;;  %2304 = vmatprep.subr.mxu1 %v1306_v6  ;;  %v1319_v19 = vld [vmem:[#allocation15 + $0x108] sm:$0xff] }
 0x29a   : > { %2343 = vmatpush3.msra.mxu0 %v1322_v7  ;;  %2305 = vmatpush3.msra.mxu1 %v1290_v8  ;;  %v1365_v7 = vld [vmem:[#allocation15 + $0x278] sm:$0xff]  ;;  %v1412_v8 = vld [vmem:[#allocation15 + $0x3f0] sm:$0xff] }
 0x29b   : > { %v1102_v21 = vadd.f32 %v2184_v9, %v1093_v20  ;;  %v1337_v9 = vld [vmem:[#allocation15 + $0x198] sm:$0xff]  ;;  %2306 = vmatprep.subr.mxu1 %v1305_v10  ;;  %v1287_v20 = vld [vmem:[#allocation15 + $0x8] sm:$0xff]  ;;  %v1396_v10 = vld [vmem:[#allocation15 + $0x370] sm:$0xff] }
 0x29c   : > { %2344 = vmatprep.subr.mxu0 %v1337_v9  ;;  %2307 = vmatpush3.msra.mxu1 %v1289_v12  ;;  %v1380_v9 = vld [vmem:[#allocation15 + $0x2f0] sm:$0xff]  ;;  %v1411_v12 = vld [vmem:[#allocation15 + $0x3e8] sm:$0xff] }
 0x29d   : > { %v1104_v22 = vmax.f32 %v1102_v21, 0.0  ;;  %2345 = vmatpush3.msra.mxu0 %v1321_v11  ;;  %2308 = vmatprep.subr.mxu1 %v1304_v14  ;;  %v1334_v21 = vld [vmem:[#allocation15 + $0x180] sm:$0xff]  ;;  %v1364_v11 = vld [vmem:[#allocation15 + $0x270] sm:$0xff]  ;;  %v1395_v14 = vld [vmem:[#allocation15 + $0x368] sm:$0xff] }
 0x29e   : > { %2346 = vmatprep.subr.mxu0 %v1336_v13  ;;  %2309 = vmatpush3.msra.mxu1 %v1288_v16  ;;  %v1379_v13 = vld [vmem:[#allocation15 + $0x2e8] sm:$0xff]  ;;  %v1410_v16 = vld [vmem:[#allocation15 + $0x3e0] sm:$0xff] }
 0x29f   : > { %v1117_v23 = vrot.slane %v1104_v22, 7  ;;  %2347 = vmatpush3.msra.mxu0 %v1320_v15  ;;  %v1302_v22 = vld [vmem:[#allocation15 + $0x80] sm:$0xff]  ;;  %v1363_v15 = vld [vmem:[#allocation15 + $0x268] sm:$0xff] }
 0x2a0   : > { %2348 = vmatprep.subr.mxu0 %v1335_v17  ;;  %v1378_v17 = vld [vmem:[#allocation15 + $0x2e0] sm:$0xff] }
 0x2a1   : > { %1123 = vrot.lane.b32.xlu0 %v1117_v23, %s3120_s23  ;;  %v1118_v24 = vsel %vm1115_vm9, %v1116_v18, %v1117_v23  ;;  %v1303_v18 = vld [vmem:[#allocation15 + $0x88] sm:$0xff]  ;;  %2349 = vmatpush3.msra.mxu0 %v1319_v19  ;;  %v1318_v23 = vld [vmem:[#allocation15 + $0x100] sm:$0xff] }
 0x2a2   : > { %1121 = vrot.lane.b32.xlu1 %v1118_v24, %s3120_s23  ;;  %2310 = vmatprep.subr.mxu1 %v1303_v18  ;;  %v1286_v24 = vld [vmem:[#allocation15] sm:$0xff] }
 0x2a3   : > { %2311 = vmatpush3.msra.mxu1 %v1287_v20  ;;  %2350 = vmatprep.subr.mxu0 %v1334_v21  ;;  %v1394_v18 = vld [vmem:[#allocation15 + $0x360] sm:$0xff]  ;;  %v1409_v20 = vld [vmem:[#allocation15 + $0x3d8] sm:$0xff] }
 0x2a4   : > { %2312 = vmatprep.subr.mxu1 %v1302_v22  ;;  %2351 = vmatpush3.msra.mxu0 %v1318_v23  ;;  %v1362_v19 = vld [vmem:[#allocation15 + $0x260] sm:$0xff]  ;;  %v1377_v21 = vld [vmem:[#allocation15 + $0x2d8] sm:$0xff] }
 0x2a5   : > { %2313 = vmatpush3.msra.mxu1 %v1286_v24  ;;  %2396 = vmatprep.subr.mxu0 %v1413_v25  ;;  %v1393_v23 = vld [vmem:[#allocation15 + $0x358] sm:$0xff] }
 0x2a6   : > { %2358 = vmatprep.subr.mxu1 %v1381_v27  ;;  %v1361_v24 = vld [vmem:[#allocation15 + $0x258] sm:$0xff]  ;;  %v1408_v27 = vld [vmem:[#allocation15 + $0x3d0] sm:$0xff] }
 0x309   : > { %v1120_v26 = vpop.permute.xlu0 %1119 }
 0x30a   : > { %1129 = vst.msk [vmem:[#allocation4] sm:$0xfe] %vm1128_vm10, %v1120_v26 }
 0x30b   : > { %1131 = vst.msk [vmem:[#allocation4 + $0x8] sm:$0xfe] %vm1130_vm11, %v1120_v26 }
 0x311   : > { %v3441_v0 = vld [vmem:[#allocation4] sm:$0xff] }
 0x312   : > { %v1141_v28 = vld [vmem:[#allocation4 + $0x8] sm:$0xff]  ;;  %v1183_v34 = vrot.slane %v3441_v0, 1  ;;  %v1226_v46 = vrot.slane %v3441_v0, 2 }
 0x313   : > { %v2693_v29 = vpack.i.bf16 %v1141_v28, %v3441_v0  ;;  %v1124_v30 = vpop.permute.xlu0 %1123  ;;  %v1193_v37 = vrot.slane %v1141_v28, 1  ;;  %v1235_v47 = vrot.slane %v1141_v28, 2  ;;  %v1392_v28 = vld [vmem:[#allocation15 + $0x350] sm:$0xff] }
 0x314   : > { %1137 = vst.msk [vmem:[#allocation4 + $0x20] sm:$0x1] %vm1136_vm12, %v1124_v30  ;;  %v1122_v31 = vpop.permute.xlu1 %1121 }
 0x315   : > { %2694 = vrot.lane.b32.xlu0 %v2693_v29, %s3121_s4  ;;  %2689 = vrot.lane.b32.xlu1 %v2693_v29, %s3116_s20  ;;  %1139 = vst.msk [vmem:[#allocation4 + $0x28] sm:$0x1] %vm1138_vm13, %v1124_v30  ;;  %v1360_v29 = vld [vmem:[#allocation15 + $0x250] sm:$0xff] }
 0x316   : > { %1133 = vst.msk [vmem:[#allocation4 + $0x10] sm:$0xff] %vm1132_vm14, %v1122_v31 }
 0x317   : > { %1135 = vst.msk [vmem:[#allocation4 + $0x18] sm:$0xff] %vm1134_vm15, %v1122_v31  ;;  %v1407_v31 = vld [vmem:[#allocation15 + $0x3c8] sm:$0xff] }
 0x31b   : > { %v1144_v41 = vld [vmem:[#allocation4 + $0x20] sm:$0x3] }
 0x31c   : > { %v1145_v42 = vld [vmem:[#allocation4 + $0x28] sm:$0x3]  ;;  %v1186_v48 = vrot.slane %v1144_v41, 1  ;;  %v1229_v52 = vrot.slane %v1144_v41, 2  ;;  %v1390_v41 = vld [vmem:[#allocation15 + $0x340] sm:$0xff] }
 0x31d   : > { %v3446_v32 = vld [vmem:[#allocation4 + $0x10] sm:$0xff]  ;;  %v1196_v49 = vrot.slane %v1145_v42, 1  ;;  %v1238_v56 = vrot.slane %v1145_v42, 2  ;;  %v1374_v42 = vld [vmem:[#allocation15 + $0x2c0] sm:$0xff] }
 0x31e   : > { %v1143_v33 = vld [vmem:[#allocation4 + $0x18] sm:$0xff]  ;;  %v1184_v36 = vrot.slane %v3446_v32, 1  ;;  %v1227_v39 = vrot.slane %v3446_v32, 2 }
 0x31f   : > { %v2698_v35 = vpack.i.bf16 %v1143_v33, %v3446_v32  ;;  %v1194_v38 = vrot.slane %v1143_v33, 1  ;;  %v1236_v40 = vrot.slane %v1143_v33, 2 }
 0x320   : > { %v1185_v43 = vsel %vm716_vm4, %v1183_v34, %v1184_v36  ;;  %v3458_v50 = vsel %vm746_vm5, %v1226_v46, %v1227_v39  ;;  %v1187_v54 = vsel %vm716_vm4, %v1184_v36, %v1186_v48  ;;  %v3468_v58 = vsel %vm746_vm5, %v1227_v39, %v1229_v52  ;;  %v1375_v36 = vld [vmem:[#allocation15 + $0x2c8] sm:$0xff]  ;;  %v1406_v39 = vld [vmem:[#allocation15 + $0x3c0] sm:$0xff]  ;;  %v1405_v48 = vld [vmem:[#allocation15 + $0x3b8] sm:$0xff] }
 0x321   : > { %2699 = vrot.lane.b32.xlu1 %v2698_v35, %s3116_s20  ;;  %v1195_v44 = vsel %vm716_vm4, %v1193_v37, %v1194_v38  ;;  %1569 = vmatprep.mubr.f32.mxu0 %v1185_v43  ;;  %v1237_v51 = vsel %vm746_vm5, %v1235_v47, %v1236_v40  ;;  %v1197_v55 = vsel %vm716_vm4, %v1194_v38, %v1196_v49  ;;  %v1391_v38 = vld [vmem:[#allocation15 + $0x348] sm:$0xff]  ;;  %v1389_v52 = vld [vmem:[#allocation15 + $0x338] sm:$0xff] }
 0x322   : > { %v2703_v45 = vpack.i.bf16 %v1195_v44, %v1185_v43  ;;  %v2718_v53 = vpack.i.bf16 %v1237_v51, %v3458_v50  ;;  %v2723_v57 = vpack.i.bf16 %v1197_v55, %v1187_v54  ;;  %v1239_v59 = vsel %vm746_vm5, %v1236_v40, %v1238_v56  ;;  %v1359_v40 = vld [vmem:[#allocation15 + $0x248] sm:$0xff]  ;;  %v1373_v51 = vld [vmem:[#allocation15 + $0x2b8] sm:$0xff]  ;;  %v1404_v56 = vld [vmem:[#allocation15 + $0x3b0] sm:$0xff] }
 0x323   : > { %v2733_v60 = vpack.i.bf16 %v1239_v59, %v3468_v58  ;;  %v1357_v55 = vld [vmem:[#allocation15 + $0x238] sm:$0xff]  ;;  %v1356_v59 = vld [vmem:[#allocation15 + $0x230] sm:$0xff] }
 0x324   : > { %2704 = vrot.lane.b32.xlu0 %v2703_v45, %s3121_s4 }
 0x325   : > { %2709 = vrot.lane.b32.xlu1 %v2703_v45, %s3116_s20  ;;  %v1358_v45 = vld [vmem:[#allocation15 + $0x240] sm:$0xff] }
 0x328   : > { %2714 = vrot.lane.b32.xlu0 %v2698_v35, %s3121_s4 }
 0x329   : > { %2719 = vrot.lane.b32.xlu1 %v2718_v53, %s3116_s20 }
 0x32c   : > { %2724 = vrot.lane.b32.xlu0 %v2723_v57, %s3121_s4 }
 0x32d   : > { %2729 = vrot.lane.b32.xlu1 %v2723_v57, %s3116_s20  ;;  %v1372_v57 = vld [vmem:[#allocation15 + $0x2b0] sm:$0xff] }
 0x330   : > { %2734 = vrot.lane.b32.xlu0 %v2733_v60, %s3116_s20  ;;  %s3021_s20 = scalar_lea.vmem %s3020_s26, 512 }
 0x331   : > { %2739 = vrot.lane.b32.xlu1 %v2718_v53, %s3121_s4 }
 0x334   : > { %2744 = vrot.lane.b32.xlu0 %v2733_v60, %s3121_s4  ;;  %s646_s4 = scalar_lea.vmem [#allocation23], %s2176_s21 }
 0x335   : > { %s1992_s27 = sshll.u32 %s646_s4, 4  ;;  %s3532_s27 = int_to_ptr.vmem [resolvable:$true] %s1992_s27 }
 0x336   : > { %p3022_p1 = scmp.lt.s32.totalorder %s3532_s27, %s3020_s26 }
 0x387   : > { %v2690_v61 = vpop.permute.xlu1 %2689  ;;  %v2695_v62 = vpop.permute.xlu0 %2694 }
 0x388   : > { %v2692_v63 = vunpack.i.h.bf16 %v2690_v61  ;;  %v2691_v1 = vunpack.i.l.bf16 %v2690_v61  ;;  %v2697_v2 = vunpack.i.h.bf16 %v2695_v62  ;;  %v2696_v3 = vunpack.i.l.bf16 %v2695_v62  ;;  %v1403_v61 = vld [vmem:[#allocation15 + $0x3a8] sm:$0xff] }
 0x389   : > { %v1371_v62 = vld [vmem:[#allocation15 + $0x2a8] sm:$0xff] }
 0x38a   : > { %v1161_v5 = vsel %vm1160_vm0, %v2691_v1, %v2692_v63  ;;  %v1176_v6 = vsel %vm1175_vm1, %v2696_v3, %v2697_v2  ;;  %v1387_v63 = vld [vmem:[#allocation15 + $0x328] sm:$0xff] }
 0x38b   : > { %1494 = vmatprep.mubr.f32.mxu1 %v1161_v5  ;;  %1570 = vmatmul.mubr.f32.vlgmr.msra.gmra.mxu0 %v1176_v6  ;;  %v1355_v3 = vld [vmem:[#allocation15 + $0x228] sm:$0xff]  ;;  %v1370_v5 = vld [vmem:[#allocation15 + $0x2a0] sm:$0xff] }
 0x38c   : > { %2397 = vmatpush3.msra.mxu0 %v1397_v4  ;;  %1495 = vmatmul.mubr.f32.vlgmr.msra.gmra.mxu1 %v3441_v0  ;;  %v1376_v0 = vld [vmem:[#allocation15 + $0x2d0] sm:$0xff]  ;;  %v1402_v4 = vld [vmem:[#allocation15 + $0x3a0] sm:$0xff] }
 0x38d   : > { %1574 = vmatprep.mubr.f32.mxu0 %v1187_v54  ;;  %2359 = vmatpush3.msra.mxu1 %v1365_v7  ;;  %v1386_v6 = vld [vmem:[#allocation15 + $0x320] sm:$0xff] }
 0x38e   : > { %2398 = vmatprep.subr.mxu0 %v1412_v8  ;;  %2360 = vmatprep.subr.mxu1 %v1380_v9  ;;  %v1354_v7 = vld [vmem:[#allocation15 + $0x220] sm:$0xff]  ;;  %v1401_v8 = vld [vmem:[#allocation15 + $0x398] sm:$0xff] }
 0x38f   : > { %2399 = vmatpush3.msra.mxu0 %v1396_v10  ;;  %2361 = vmatpush3.msra.mxu1 %v1364_v11  ;;  %v1369_v9 = vld [vmem:[#allocation15 + $0x298] sm:$0xff] }
 0x390   : > { %2400 = vmatprep.subr.mxu0 %v1411_v12  ;;  %2362 = vmatprep.subr.mxu1 %v1379_v13  ;;  %v1385_v10 = vld [vmem:[#allocation15 + $0x318] sm:$0xff]  ;;  %v1400_v12 = vld [vmem:[#allocation15 + $0x390] sm:$0xff] }
 0x391   : > { %2401 = vmatpush3.msra.mxu0 %v1395_v14  ;;  %2363 = vmatpush3.msra.mxu1 %v1363_v15  ;;  %v1353_v11 = vld [vmem:[#allocation15 + $0x218] sm:$0xff]  ;;  %v1368_v13 = vld [vmem:[#allocation15 + $0x290] sm:$0xff] }
 0x392   : > { %2402 = vmatprep.subr.mxu0 %v1410_v16  ;;  %2364 = vmatprep.subr.mxu1 %v1378_v17  ;;  %v1384_v14 = vld [vmem:[#allocation15 + $0x310] sm:$0xff] }
 0x393   : > { %v2700_v22 = vpop.permute.xlu1 %2699  ;;  %2403 = vmatpush3.msra.mxu0 %v1394_v18  ;;  %2365 = vmatpush3.msra.mxu1 %v1362_v19  ;;  %v1352_v17 = vld [vmem:[#allocation15 + $0x210] sm:$0xff]  ;;  %v1399_v18 = vld [vmem:[#allocation15 + $0x388] sm:$0xff] }
 0x394   : > { %v2702_v25 = vunpack.i.h.bf16 %v2700_v22  ;;  %v2701_v26 = vunpack.i.l.bf16 %v2700_v22  ;;  %2404 = vmatprep.subr.mxu0 %v1409_v20  ;;  %2366 = vmatprep.subr.mxu1 %v1377_v21  ;;  %v1367_v19 = vld [vmem:[#allocation15 + $0x288] sm:$0xff]  ;;  %v1398_v22 = vld [vmem:[#allocation15 + $0x380] sm:$0xff] }
 0x395   : > { %2405 = vmatpush3.msra.mxu0 %v1393_v23  ;;  %2367 = vmatpush3.msra.mxu1 %v1361_v24  ;;  %v1383_v20 = vld [vmem:[#allocation15 + $0x308] sm:$0xff] }
 0x396   : > { %v2705_v30 = vpop.permute.xlu0 %2704  ;;  %v1162_v33 = vsel %vm1160_vm0, %v2701_v26, %v2702_v25  ;;  %2406 = vmatprep.subr.mxu0 %v1408_v27  ;;  %2368 = vmatprep.subr.mxu1 %v1376_v0  ;;  %v1351_v21 = vld [vmem:[#allocation15 + $0x208] sm:$0xff]  ;;  %v1366_v27 = vld [vmem:[#allocation15 + $0x280] sm:$0xff] }
 0x397   : > { %v2707_v34 = vunpack.i.h.bf16 %v2705_v30  ;;  %v2706_v35 = vunpack.i.l.bf16 %v2705_v30  ;;  %v3481_v37 = vpop.permute.xlu1 %2709  ;;  %2407 = vmatpush3.msra.mxu0 %v1392_v28  ;;  %2369 = vmatpush3.msra.mxu1 %v1360_v29  ;;  %v1382_v0 = vld [vmem:[#allocation15 + $0x300] sm:$0xff] }
 0x398   : > { %2408 = vmatprep.subr.mxu0 %v1407_v31  ;;  %1499 = vmatprep.mubr.f32.mxu1 %v1162_v33  ;;  %v2712_v23 = vunpack.i.h.bf16 %v3481_v37  ;;  %v2711_v24 = vunpack.i.l.bf16 %v3481_v37  ;;  %v1350_v30 = vld [vmem:[#allocation15 + $0x200] sm:$0xff]  ;;  %v1429_v33 = vld [vmem:[#allocation15 + $0x478] sm:$0xff] }
 0x399   : > { %2370 = vmatprep.subr.mxu1 %v1375_v36  ;;  %2409 = vmatpush3.msra.mxu0 %v1391_v38  ;;  %v1220_v44 = vsel %vm1175_vm1, %v2706_v35, %v2707_v34 }
 0x39a   : > { %v2715_v43 = vpop.permute.xlu0 %2714  ;;  %1500 = vmatmul.mubr.f32.gmra.mxu1 %v3446_v32  ;;  %2410 = vmatprep.subr.mxu0 %v1406_v39  ;;  %v1388_v32 = vld [vmem:[#allocation15 + $0x330] sm:$0xff]  ;;  %v1206_v34 = vsel %vm1160_vm0, %v2711_v24, %v2712_v23 }
 0x39b   : > { %v2717_v46 = vunpack.i.h.bf16 %v2715_v43  ;;  %v2716_v47 = vunpack.i.l.bf16 %v2715_v43  ;;  %v2720_v49 = vpop.permute.xlu1 %2719  ;;  %2371 = vmatpush3.msra.mxu1 %v1359_v40  ;;  %2411 = vmatpush3.msra.mxu0 %v1390_v41  ;;  %v1428_v39 = vld [vmem:[#allocation15 + $0x470] sm:$0xff]  ;;  %v1426_v43 = vld [vmem:[#allocation15 + $0x460] sm:$0xff] }
 0x39c   : > { %2372 = vmatprep.subr.mxu1 %v1374_v42  ;;  %1644 = vmatprep.mubr.f32.mxu1 %v1220_v44  ;;  %v2722_v53 = vunpack.i.h.bf16 %v2720_v49  ;;  %v2721_v54 = vunpack.i.l.bf16 %v2720_v49  ;;  %v1427_v42 = vld [vmem:[#allocation15 + $0x468] sm:$0xff]  ;;  %v1420_v49 = vld [vmem:[#allocation15 + $0x430] sm:$0xff] }
 0x39d   : > { %2373 = vmatpush3.msra.mxu1 %v1358_v45  ;;  %2412 = vmatprep.subr.mxu0 %v1405_v48  ;;  %v1177_v60 = vsel %vm1175_vm1, %v2716_v47, %v2717_v46  ;;  %v1425_v45 = vld [vmem:[#allocation15 + $0x458] sm:$0xff]  ;;  %v1424_v46 = vld [vmem:[#allocation15 + $0x450] sm:$0xff]  ;;  %v1423_v47 = vld [vmem:[#allocation15 + $0x448] sm:$0xff] }
 0x39e   : > { %2374 = vmatprep.subr.mxu1 %v1373_v51  ;;  %2413 = vmatpush3.msra.mxu0 %v1389_v52  ;;  %v1248_v1 = vsel %vm1160_vm0, %v2721_v54, %v2722_v53  ;;  %v3487_v2 = vpop.permute.xlu0 %2724  ;;  %v1421_v48 = vld [vmem:[#allocation15 + $0x438] sm:$0xff]  ;;  %v1419_v51 = vld [vmem:[#allocation15 + $0x428] sm:$0xff]  ;;  %v1418_v52 = vld [vmem:[#allocation15 + $0x420] sm:$0xff] }
 0x39f   : > { %2375 = vmatpush3.msra.mxu1 %v1357_v55  ;;  %2414 = vmatprep.subr.mxu0 %v1404_v56  ;;  %v2730_v15 = vpop.permute.xlu1 %2729  ;;  %v2727_v28 = vunpack.i.h.bf16 %v3487_v2  ;;  %v2726_v29 = vunpack.i.l.bf16 %v3487_v2  ;;  %v1417_v53 = vld [vmem:[#allocation15 + $0x418] sm:$0xff]  ;;  %v1416_v54 = vld [vmem:[#allocation15 + $0x410] sm:$0xff]  ;;  %v1415_v56 = vld [vmem:[#allocation15 + $0x408] sm:$0xff] }
 0x3a0   : > { %2376 = vmatprep.subr.mxu1 %v1372_v57  ;;  %2415 = vmatpush3.msra.mxu0 %v1388_v32  ;;  %v2732_v36 = vunpack.i.h.bf16 %v2730_v15  ;;  %v2731_v37 = vunpack.i.l.bf16 %v2730_v15 }
 0x3a1   : > { %2377 = vmatpush3.msra.mxu1 %v1356_v59  ;;  %1575 = vmatmul.mubr.f32.gmra.mxu0 %v1177_v60  ;;  %v1221_v38 = vsel %vm1175_vm1, %v2726_v29, %v2727_v28  ;;  %v1414_v59 = vld [vmem:[#allocation15 + $0x400] sm:$0xff] }
 0x3a2   : > { %2416 = vmatprep.subr.mxu0 %v1403_v61  ;;  %2378 = vmatprep.subr.mxu1 %v1371_v62  ;;  %v2735_v16 = vpop.permute.xlu0 %2734 }
 0x3a3   : > { %2417 = vmatpush3.msra.mxu0 %v1387_v63  ;;  %1719 = vmatprep.mubr.f32.mxu0 %v1248_v1  ;;  %v2737_v25 = vunpack.i.h.bf16 %v2735_v16  ;;  %v2736_v26 = vunpack.i.l.bf16 %v2735_v16  ;;  %v2740_v31 = vpop.permute.xlu1 %2739 }
 0x3a4   : > { %2379 = vmatpush3.msra.mxu1 %v1355_v3  ;;  %2418 = vmatprep.subr.mxu0 %v1402_v4  ;;  %v2742_v40 = vunpack.i.h.bf16 %v2740_v31  ;;  %v2741_v41 = vunpack.i.l.bf16 %v2740_v31 }
 0x3a5   : > { %2380 = vmatprep.subr.mxu1 %v1370_v5  ;;  %2419 = vmatpush3.msra.mxu0 %v1386_v6  ;;  %v1249_v35 = vsel %vm1160_vm0, %v2736_v26, %v2737_v25 }
 0x3a6   : > { %2381 = vmatpush3.msra.mxu1 %v1354_v7  ;;  %2420 = vmatprep.subr.mxu0 %v1401_v8  ;;  %v1262_v44 = vsel %vm1175_vm1, %v2741_v41, %v2742_v40  ;;  %v2745_v55 = vpop.permute.xlu0 %2744  ;;  %v2185_v41 = vld [vmem:[#allocation17] ss:$0 sm:$0xff] }
 0x3a7   : > { %2382 = vmatprep.subr.mxu1 %v1369_v9  ;;  %2421 = vmatpush3.msra.mxu0 %v1385_v10  ;;  %v2747_v57 = vunpack.i.h.bf16 %v2745_v55  ;;  %v2746_v32 = vunpack.i.l.bf16 %v2745_v55  ;;  %v1826_v55 = vld [vmem:[#allocation20 + $0x8] sm:$0xff] }
 0x3a8   : > { %2383 = vmatpush3.msra.mxu1 %v1353_v11  ;;  %2422 = vmatprep.subr.mxu0 %v1400_v12 }
 0x3a9   : > { %2384 = vmatprep.subr.mxu1 %v1368_v13  ;;  %2423 = vmatpush3.msra.mxu0 %v1384_v14  ;;  %v1263_v60 = vsel %vm1175_vm1, %v2746_v32, %v2747_v57  ;;  %v1925_v32 = vld [vmem:[%s3591_s11] sm:$0xff] }
 0x3aa   : > { %2385 = vmatpush3.msra.mxu1 %v1352_v17  ;;  %2424 = vmatprep.subr.mxu0 %v1399_v18 }
 0x3ab   : > { %2386 = vmatprep.subr.mxu1 %v1367_v19  ;;  %2425 = vmatpush3.msra.mxu0 %v1383_v20 }
 0x3ac   : > { %2387 = vmatpush3.msra.mxu1 %v1351_v21  ;;  %2426 = vmatprep.subr.mxu0 %v1398_v22 }
 0x3ad   : > { %2388 = vmatprep.subr.mxu1 %v1366_v27  ;;  %2427 = vmatpush3.msra.mxu0 %v1382_v0 }
 0x3ae   : > { %2389 = vmatpush3.msra.mxu1 %v1350_v30  ;;  %1720 = vmatmul.mubr.f32.vlgmr.msra.gmra.mxu0 %v3458_v50  ;;  %v1207_v50 = vsel %vm1160_vm0, %v2731_v37, %v2732_v36 }
 0x3af   : > { %1645 = vmatmul.mubr.f32.vlgmr.msra.gmra.mxu1 %v1206_v34  ;;  %1724 = vmatprep.mubr.f32.mxu0 %v1249_v35 }
 0x3b0   : > { %2481 = vmatprep.subr.mxu1 %v1429_v33  ;;  %1649 = vmatprep.mubr.f32.mxu1 %v1221_v38  ;;  %v1921_v38 = vld [vmem:[%s3590_s10] sm:$0xff] }
 0x3b1   : > { %2482 = vmatpush3.msra.mxu1 %v1429_v33 }
 0x3b2   : > { %2483 = vmatprep.subr.mxu1 %v1428_v39  ;;  %1725 = vmatmul.mubr.f32.gmra.mxu0 %v3468_v58  ;;  %v1422_v58 = vld [vmem:[#allocation15 + $0x440] sm:$0xff] }
 0x3b3   : > { %2484 = vmatpush3.msra.mxu1 %v1428_v39 }
 0x3b4   : > { %1650 = vmatmul.mubr.f32.gmra.mxu1 %v1207_v50  ;;  %2485 = vmatprep.subr.mxu1 %v1427_v42 }
 0x3b5   : > { %2486 = vmatpush3.msra.mxu1 %v1427_v42  ;;  %2513 = vmatprep.mubr.f32.mxu1 %v1262_v44  ;;  %v2753_v42 = vld [vmem:[%s3393_s24] sm:$0xff]  ;;  %v1831_v44 = vld [vmem:[#allocation20 + $0x30] sm:$0xff] }
 0x3b6   : > { %2487 = vmatprep.subr.mxu1 %v1426_v43  ;;  %v1812_v50 = vmul.f32 %v2753_v42, %v2185_v41 }
 0x3b7   : > { %2488 = vmatpush3.msra.mxu1 %v1426_v43  ;;  %v1832_v43 = vld [vmem:[#allocation20 + $0x38] sm:$0xff] }
 0x3b8   : > { %2489 = vmatprep.subr.mxu1 %v1425_v45  ;;  %2516 = vmatprep.subr.mxu0 %v1832_v43 }
 0x3b9   : > { %2490 = vmatpush3.msra.mxu1 %v1425_v45  ;;  %2517 = vmatpush3.msra.mxu0 %v1832_v43  ;;  %v1830_v45 = vld [vmem:[#allocation20 + $0x28] sm:$0xff] }
 0x3ba   : > { %2491 = vmatprep.subr.mxu1 %v1424_v46  ;;  %2518 = vmatprep.subr.mxu0 %v1831_v44 }
 0x3bb   : > { %2492 = vmatpush3.msra.mxu1 %v1424_v46  ;;  %v2186_v46 = vld [vmem:[#allocation18] ss:$0 sm:$0xff]  ;;  %2519 = vmatpush3.msra.mxu0 %v1831_v44 }
 0x3bc   : > { %2493 = vmatprep.subr.mxu1 %v1423_v47  ;;  %2520 = vmatprep.subr.mxu0 %v1830_v45 }
 0x3bd   : > { %2494 = vmatpush3.msra.mxu1 %v1423_v47  ;;  %v1821_v47 = vadd.f32 %v2186_v46, %v1812_v50  ;;  %2521 = vmatpush3.msra.mxu0 %v1830_v45 }
 0x3be   : > { %2495 = vmatprep.subr.mxu1 %v1422_v58 }
 0x3bf   : > { %2496 = vmatpush3.msra.mxu1 %v1422_v58  ;;  %v1829_v58 = vld [vmem:[#allocation20 + $0x20] sm:$0xff] }
 0x3c0   : > { %2497 = vmatprep.subr.mxu1 %v1421_v48  ;;  %2522 = vmatprep.subr.mxu0 %v1829_v58 }
 0x3c1   : > { %2498 = vmatpush3.msra.mxu1 %v1421_v48  ;;  %v2754_v48 = vld [vmem:[%s3393_s24 + $0x8] sm:$0xff]  ;;  %2523 = vmatpush3.msra.mxu0 %v1829_v58  ;;  %s3015_s24 = scalar_lea.vmem %s3532_s27, 256 }
 0x3c2   : > { %2499 = vmatprep.subr.mxu1 %v1420_v49  ;;  %p3016_p6 = scmp.ne.s32.totalorder %s3532_s27, %s3015_s24  ;;  %p3023_p2 = scmp.lt.s32.totalorder %s3021_s20, %s3015_s24 }
 0x3c3   : > { %2500 = vmatpush3.msra.mxu1 %v1420_v49  ;;  %v1813_v49 = vmul.f32 %v2754_v48, %v2185_v41 }
 0x3c4   : > { %2501 = vmatprep.subr.mxu1 %v1419_v51  ;;  %p3017_p13 = pnand %p3016_p6, %p3641_p10  ;;  %p3024_p12 = por %p3023_p2, %p3022_p1 }
 0x3c5   : > { %2502 = vmatpush3.msra.mxu1 %v1419_v51  ;;  %v1823_v51 = vmax.f32 %v1821_v47, 0.0 }
 0x3c6   : > { %2503 = vmatprep.subr.mxu1 %v1418_v52  ;;  %p3018_p0 = pneg %p3017_p13 }
 0x3c7   : > { %2504 = vmatpush3.msra.mxu1 %v1418_v52  ;;  %v1828_v52 = vld [vmem:[#allocation20 + $0x18] sm:$0xff]  ;;  %2532 = vmatprep.mubr.msk.f32.mxu0 %vm693_vm3, %v1823_v51 }
 0x3c8   : > { %2505 = vmatprep.subr.mxu1 %v1417_v53  ;;  %2524 = vmatprep.subr.mxu0 %v1828_v52  ;;  %p3025_p3 = pnand %p3024_p12, %p3018_p0 }
 0x3c9   : > { %2506 = vmatpush3.msra.mxu1 %v1417_v53  ;;  %v1827_v53 = vld [vmem:[#allocation20 + $0x10] sm:$0xff]  ;;  %2525 = vmatpush3.msra.mxu0 %v1828_v52 }
 0x3ca   : > { %2507 = vmatprep.subr.mxu1 %v1416_v54  ;;  %2526 = vmatprep.subr.mxu0 %v1827_v53 }
 0x3cb   : > { %2508 = vmatpush3.msra.mxu1 %v1416_v54  ;;  %v1822_v54 = vadd.f32 %v2186_v46, %v1813_v49  ;;  %2527 = vmatpush3.msra.mxu0 %v1827_v53 }
 0x3cc   : > { %2509 = vmatprep.subr.mxu1 %v1415_v56  ;;  %2528 = vmatprep.subr.mxu0 %v1826_v55 }
 0x3cd   : > { %2510 = vmatpush3.msra.mxu1 %v1415_v56  ;;  %v1825_v56 = vld [vmem:[#allocation20] sm:$0xff]  ;;  %v1824_v57 = vmax.f32 %v1822_v54, 0.0  ;;  %2529 = vmatpush3.msra.mxu0 %v1826_v55 }
 0x3ce   : > { %2511 = vmatprep.subr.mxu1 %v1414_v59  ;;  %2530 = vmatprep.subr.mxu0 %v1825_v56 }
 0x3cf   : > { %2512 = vmatpush3.msra.mxu1 %v1414_v59  ;;  %2531 = vmatpush3.msra.mxu0 %v1825_v56 }
 0x3d0   : > { %2514 = vmatmul.mubr.f32.vlgmr.msra.gmra.mxu1 %v1263_v60  ;;  %2533 = vmatmul.mubr.msk.f32.vlgmr.msra.gmra.mxu0 %vm693_vm3, %v1824_v57 }
 0x44b   : > { %v2352_v63 = vpop.f32.mrf.mxu0 }
 0x44c   : > { %v2314_v61 = vpop.f32.mrf.mxu1 }
 0x44d   : > { %v2353_v2 = vpop.f32.mrf.mxu0 }
 0x44e   : > { %v2315_v62 = vpop.f32.mrf.mxu1  ;;  %v2354_v12 = vadd.f32 %v2353_v2, %v2352_v63  ;;  %v1939_v2 = vlaneseq }
 0x44f   : > { %v2316_v13 = vadd.f32 %v2315_v62, %v2314_v61 }
 0x451   : > { %v1572_v19 = vadd.f32 %v2354_v12, %v2316_v13 }
 0x45a   : > { %v2317_v1 = vpop.f32.mrf.mxu1 }
 0x45c   : > { %v2318_v3 = vpop.f32.mrf.mxu1 }
 0x45d   : > { %v2319_v16 = vadd.f32 %v2318_v3, %v2317_v1 }
 0x461   : > { %v2355_v4 = vpop.f32.mrf.mxu0 }
 0x463   : > { %v2356_v6 = vpop.f32.mrf.mxu0 }
 0x464   : > { %v2357_v14 = vadd.f32 %v2356_v6, %v2355_v4  ;;  %v1935_v6 = vld [vmem:[#allocation21] sm:$0x1] }
 0x466   : > { %v1577_v20 = vadd.f32 %v2357_v14, %v2319_v16  ;;  %v1947_v16 = vld [vmem:[%s3594_s14] sm:$0xff] }
 0x46e   : > { %v2428_v8 = vpop.f32.mrf.mxu0 }
 0x46f   : > { %v2390_v5 = vpop.f32.mrf.mxu1 }
 0x470   : > { %v2429_v10 = vpop.f32.mrf.mxu0 }
 0x471   : > { %v2391_v7 = vpop.f32.mrf.mxu1  ;;  %v2430_v24 = vadd.f32 %v2429_v10, %v2428_v8 }
 0x472   : > { %v2431_v15 = vpop.f32.mrf.mxu0  ;;  %v2392_v17 = vadd.f32 %v2391_v7, %v2390_v5  ;;  %v1940_v5 = vshrl.u32 %v1939_v2, 7 }
 0x474   : > { %v2393_v9 = vpop.f32.mrf.mxu1  ;;  %v2432_v21 = vpop.f32.mrf.mxu0  ;;  %v1647_v22 = vadd.f32 %v2392_v17, %v1572_v19 }
 0x475   : > { %v2433_v25 = vadd.f32 %v2432_v21, %v2431_v15  ;;  %v3122_v15 = vmov 0  }
 0x476   : > { %v2394_v11 = vpop.f32.mrf.mxu1  ;;  %v1722_v0 = vadd.f32 %v2430_v24, %v1647_v22  ;;  %2748 = vset.pattern.permute.xlu0 %v3122_v15 }
 0x477   : > { %v2395_v18 = vadd.f32 %v2394_v11, %v2393_v9  ;;  %v1941_v9 = vsub.s32 0, %v1940_v5  ;;  %v1938_v11 = vld [vmem:[%s3593_s13] sm:$0xff] }
 0x479   : > { %v1652_v23 = vadd.f32 %v2395_v18, %v1577_v20 }
 0x47b   : > { %v1727_v27 = vadd.f32 %v2433_v25, %v1652_v23 }
 0x490   : > { %v2515_v26 = vpop.f32.mrf.mxu1 }
 0x491   : > { %v3501_v29 = vadd.f32 %v2515_v26, %v1727_v27  ;;  %v1959_v27 = vld [vmem:[%s3595_s15] sm:$0xff] }
 0x492   : > { %v1796_v28 = vpop.f32.mrf.mxu1 }
 0x493   : > { %v3503_v30 = vadd.f32 %v1796_v28, %v1722_v0 }
 0x495   : > { %v1914_v31 = vadd.f32 %v3501_v29, %v3503_v30 }
 0x497   : > { %v1915_v33 = vrot.slane %v1914_v31, 4 }
 0x499   : > { %v1916_v34 = vadd.f32 %v1915_v33, %v1914_v31 }
 0x49b   : > { %v1917_v35 = vrot.slane %v1916_v34, 2 }
 0x49d   : > { %v1918_v36 = vadd.f32 %v1917_v35, %v1916_v34 }
 0x49f   : > { %v1919_v37 = vrot.slane %v1918_v36, 1 }
 0x4a1   : > { %v1920_v39 = vadd.f32 %v1919_v37, %v1918_v36  ;;  %v2534_v37 = vpop.f32.mrf.mxu0 }
 0x4a3   : > { %v1922_v40 = vmul.f32 %v1921_v38, %v1920_v39  ;;  %v1905_v41 = vpop.f32.mrf.mxu0 }
 0x4a5   : > { %1923 = vadd.xlane.f32.xlu1 %v1922_v40 }
 0x52e   : > { %v1924_v59 = vpop.xlane.xlu1 %1923 }
 0x52f   : > { %v1926_v60 = vmul.f32 %v1925_v32, %v1924_v59 }
 0x531   : > { %v1928_v61 = vsel %vm1927_vm2, %v1926_v60, 0.0 }
 0x532   : > { %v1929_v62 = vrot.slane %v1928_v61, 4 }
 0x534   : > { %v1930_v63 = vadd.f32 %v1929_v62, %v1928_v61 }
 0x536   : > { %v1931_v1 = vrot.slane %v1930_v63, 2 }
 0x538   : > { %v1932_v3 = vadd.f32 %v1931_v1, %v1930_v63 }
 0x53a   : > { %v1933_v4 = vrot.slane %v1932_v3, 1 }
 0x53c   : > { %v1934_v7 = vadd.f32 %v1933_v4, %v1932_v3 }
 0x53e   : > { %v1936_v8 = vadd.f32 %v1935_v6, %v1934_v7 }
 0x540   : > { %v1937_v10 = vmax.f32 %v1936_v8, 0.0 }
 0x542   : > { %v1942_v12 = vrot.slane %v1937_v10, %v1941_v9 }
 0x544   : > { %v1943_v13 = vmul.f32 %v1942_v12, %v1938_v11 }
 0x546   : > { %v1944_v14 = vsel %vm1927_vm2, %v1943_v13, 0.0 }
 0x547   : > { %1945 = vadd.xlane.f32.xlu0 %v1944_v14 }
 0x5d0   : > { %v1946_v17 = vpop.xlane.xlu0 %1945 }
 0x5d1   : > { %v1948_v18 = vadd.f32 %v1947_v16, %v1946_v17 }
 0x5d3   : > { %v1949_v19 = vand.u32 2147483647, %v1948_v18  ;;  %vm1953_vm3 = vcmp.ge.f32.partialorder %v1948_v18, 0.0 }
 0x5d5   : > { %v1950_v20 = vsub.f32 0.0, %v1949_v19 }
 0x5d7   : > { %v1951_v21 = vmul.f32 1.442695, %v1950_v20 }
 0x5d9   : > { %2749 = vpow2.f32 %v1951_v21 }
 0x5e6   : > { %v2750_v22 = vpop.eup %2749 }
 0x5e7   : > { %v1954_v23 = vadd.f32 1.0, %v2750_v22 }
 0x5e9   : > { %2751 = vrcp.f32 %v1954_v23 }
 0x5f6   : > { %v2752_v24 = vpop.eup %2751 }
 0x5f7   : > { %v1957_v25 = vmul.f32 %v2752_v24, %v2750_v22 }
 0x5f9   : > { %v1958_v26 = vsel %vm1953_vm3, %v2752_v24, %v1957_v25 }
 0x5fa   : > { %1962 = vperm.xlu0 %2748, %v1958_v26  }
 0x675   : > { %v1963_v0 = vpop.permute.xlu0 %1962 }
 0x676   : > { %v1965_v28 = vmul.f32 %v1963_v0, %v1959_v27 }
 0x678   : > { %v1966_v31 = vrot.slane %v1965_v28, 4 }
 0x67a   : > { %v1967_v33 = vadd.f32 %v1966_v31, %v1965_v28 }
 0x67c   : > { %v1968_v34 = vrot.slane %v1967_v33, 2 }
 0x67e   : > { %v1969_v35 = vadd.f32 %v1968_v34, %v1967_v33 }
 0x680   : > { %v1970_v36 = vrot.slane %v1969_v35, 1 }
 0x682   : > { %v1971_v38 = vadd.f32 %v1970_v36, %v1969_v35 }
 0x684   : > { %v1973_v39 = vmul.f32 %v1971_v38, %v3501_v29  ;;  %v1972_v40 = vmul.f32 %v1971_v38, %v3503_v30 }
 0x686   : > { %v1975_v42 = vadd.f32 %v2534_v37, %v1973_v39  ;;  %v1974_v50 = vadd.f32 %v1972_v40, %v1905_v41 }
 0x688   : > { %1977 = vst [vmem:[%s646_s4 + $0x8] sm:$0xff] %v1975_v42  ;;  %1976 = vst [vmem:[%s646_s4] sm:$0xff] %v1974_v50 }
 0x689   : > { %3028 = shalt.err (!%p3025_p3)
}
 0x68a   : > { %s3029_s17 = scalar_lea.hbm %s3537_s30, 256  ;;  %s3033_s4 = scalar_lea.hbm %s3596_s16, 512 }
 0x68b   : > { %p3030_p4 = scmp.ne.s32.totalorder %s3537_s30, %s3029_s17  ;;  %p3034_p8 = scmp.lt.s32.totalorder %s3537_s30, %s3596_s16 }
 0x68c   : > { %p3035_p11 = scmp.lt.s32.totalorder %s3033_s4, %s3029_s17 }
 0x68d   : > { %p3031_p9 = pnand %p3030_p4, %p3641_p10 }
 0x68e   : > { %p3036_p5 = por %p3035_p11, %p3034_p8 }
 0x68f   : > { %p3032_p7 = pneg %p3031_p9 }
 0x691   : > { %p3037_p6 = pnand %p3036_p5, %p3032_p7 }
 0x693   : > { %3040 = shalt.err (!%p3037_p6)
}
 0x694   : > { %s3124_s28 = smov 128  }
 0x695   : > { %2575 = dma.vmem_to_hbm [thread:$0]  (%p3641_p10), %s3532_s27, 256, %s3537_s30, %s3539_s25, %s3124_s28, %s3124_s28, %s3120_s23  }
 0x696 PF: > { %s3642_s24 = sld [smem:[#allocation33_spill]] }
 0x697   : > { %s3643_s19 = sld [smem:[#allocation31_spill]] }
 0x698   : > { %s3644_s26 = sld [smem:[#allocation36_spill]] }
 0x69c   : > { %p2632_p13 = scmp.ge.s32.totalorder %s3642_s24, 2 }
 0x69d   : > { %s2007_s20 = sand.u32 1, %s3643_s19  }
 0x69e   : > { %p3645_p0 = scmp.ne.s32.totalorder %s3644_s26, 0  ;;  %s2008_s17 = scalar_lea.sflag [#allocation8], %s2007_s20 }
 0x6a0   : > { %p2609_p1 = pnand %p2632_p13, %p3645_p0 }
 0x6a2   : > { %p2610_p2 = pneg %p2609_p1 }
 0x6a4   : > { %3082 = dma.done.wait (%p2610_p2), %s2008_s17, 256  }
 0x6a5   : > { %3084 = vsyncadd (%p2610_p2), %s2008_s17, 4294967040  ;;  %s3646_s24 = sld [smem:[#allocation34_spill]]  ;;  %s3649_s21 = smov %s3091_s22 }
 0x6a6   : > { %s3647_s0 = sld [smem:[#allocation32_spill]] }
 0x6a7   : > { %s3648_s23 = sld [smem:[#allocation35_spill]] }
 0x6ab   : > { %p32_p12 = scmp.ge.s32.totalorder %s3646_s24, 4  }
 0x6ac   : > { %s3650_s22 = smov %s3647_s0 }
 0x6ad   :  { %34 = sbr.rel (!%p32_p12) target bundleno = 13 (0xd), region = 160 }
 0x6b2   :  { %2013 = vsyncpa [#allocation7], 1 }
 0x6b3   :  { %2015 = vsyncpa [#allocation7 + $0x1], 1 }
 0x6b4   :  { %2016 = vsyncpa [#allocation10], 1 }
 0x6b5   :  { %2017 = vsyncpa [#allocation13], 1 }
 0x6b6   :  { %2018 = vsyncpa [#allocation16], 1 }
 0x6b7   :  { %2019 = vsyncpa [#allocation19], 1 }
 0x6b8   :  { %2020 = vsyncpa [#allocation22], 1 }
 0x6b9   :  { %2021 = vsyncpa [#allocation8], 1 }
 0x6ba   :  { %2023 = vsyncpa [#allocation8 + $0x1], 1 }

</bundles_post_ra>
